<compile_context>
chip_gen: v7x
topology: tpu7x:2x2x1
jax: 0.10.0
libtpu: 0.0.40
codegen_flags: <defaults>
</compile_context>

<pallas_src>
import functools

import jax
import jax.numpy as jnp
import numpy as np
from jax import lax
from jax.experimental import pallas as pl
from jax.experimental.pallas import tpu as pltpu


def _dropout_uniform(key, H, G):
    """Uniform [0,1) randoms for the weight-dropout mask, drawn once per forward."""
    return jax.random.uniform(key, (H, G), jnp.float32)


def _wd_lstm_kernel(*refs, dropout_p: float, apply_dropout: bool):
    """One T-chunk of the WeightDrop-LSTM forward.

    Grid: (T // Tc,), serial ("arbitrary").  h/c state and the (masked, bf16)
    recurrent weight live in VMEM scratch and persist across grid steps.
    """
    if apply_dropout:
        (u_ref, x_ref, wih_ref, whh_ref, b_ref, h0_ref, c0_ref,
         out_ref, hN_ref, cN_ref,
         whh_scr, xg_scr, h_scr, c_scr) = refs
    else:
        (x_ref, wih_ref, whh_ref, b_ref, h0_ref, c0_ref,
         out_ref, hN_ref, cN_ref,
         whh_scr, xg_scr, h_scr, c_scr) = refs
        u_ref = None

    tc, B, D = x_ref.shape
    H = h_scr.shape[-1]
    G = 4 * H

    t_blk = pl.program_id(0)

    # ---- grid step 0: WeightDrop._setweights() + LSTM state init -------------
    @pl.when(t_blk == 0)
    def _init():
        if apply_dropout:
            keep = u_ref[...] >= jnp.float32(dropout_p)
            scale = jnp.float32(1.0 / (1.0 - dropout_p))
            whh_scr[...] = jnp.where(keep, whh_ref[...] * scale,
                                     jnp.float32(0.0)).astype(whh_scr.dtype)
        else:
            # F.dropout(..., training=False) is identity.
            whh_scr[...] = whh_ref[...].astype(whh_scr.dtype)
        h_scr[...] = h0_ref[...]
        c_scr[...] = c0_ref[...]

    # ---- hoisted input projection for the whole chunk (one big MXU matmul) ---
    x_chunk = x_ref[...].reshape(tc * B, D)                       # bf16
    xg = jnp.dot(x_chunk, wih_ref[...],
                 preferred_element_type=jnp.float32)              # (Tc*B, 4H) f32
    xg = xg + b_ref[...]                                          # bias once per chunk
    xg_scr[...] = xg.reshape(tc, B, G)

    w_rec = whh_scr[...]                                          # (H, 4H) bf16, once per chunk

    # ---- serial recurrence over the chunk ------------------------------------
    def step(t):
        h_b = h_scr[...].astype(jnp.bfloat16)
        gates = xg_scr[t] + jnp.dot(h_b, w_rec,
                                    preferred_element_type=jnp.float32)  # (B, 4H)
        i_g = jax.nn.sigmoid(gates[:, 0 * H:1 * H])
        f_g = jax.nn.sigmoid(gates[:, 1 * H:2 * H])
        g_g = jnp.tanh(gates[:, 2 * H:3 * H])
        o_g = jax.nn.sigmoid(gates[:, 3 * H:4 * H])
        c_new = f_g * c_scr[...] + i_g * g_g
        h_new = o_g * jnp.tanh(c_new)
        c_scr[...] = c_new
        h_scr[...] = h_new
        out_ref[t] = h_new.astype(out_ref.dtype)

    if tc <= 16:
        # Fully unrolled: static indices, LLO gets cross-step visibility.
        for t in range(tc):
            step(t)
    else:
        def body(t, carry):
            step(t)
            return carry
        lax.fori_loop(0, tc, body, 0)

    hN_ref[...] = h_scr[...]
    cN_ref[...] = c_scr[...]


def _vmem_estimate_bytes(tc, B, D, H, apply_dropout):
    G = 4 * H
    est = 0
    est += 2 * tc * B * D * 2           # x chunk, double-buffered, bf16
    est += 2 * tc * B * H * 4           # out chunk, double-buffered, f32
    est += 2 * D * G * 2                # W_ih bf16
    est += 2 * H * G * 4                # W_hh raw f32
    est += 2 * G * 4                    # bias
    est += 8 * B * H * 4                # h0/c0/hN/cN blocks
    if apply_dropout:
        est += 2 * H * G * 4            # uniforms
    est += H * G * 2                    # whh scratch (bf16)
    est += tc * B * G * 4               # input-projection scratch
    est += 2 * B * H * 4                # h/c scratch
    return est


def weight_drop_lstm_forward(x, h0, c0, w_ih, w_hh_raw, b_ih, b_hh, *,
                             dropout_p=0.5, training=True, dropout_key=None,
                             t_chunk=8):
    """WeightDrop(nn.LSTM).forward.

    x:        (T, B, D) float
    h0, c0:   (B, H)    float
    w_ih:     (4H, D),  w_hh_raw: (4H, H),  b_ih/b_hh: (4H,)  -- PyTorch LSTM layout
    Returns (output (T,B,H) f32, (h_n (B,H) f32, c_n (B,H) f32)).
    For best TPU performance use H a multiple of 128 and B a multiple of 8 (16 for bf16).
    """
    T, B, D = x.shape
    H = h0.shape[-1]
    G = 4 * H

    apply_dropout = bool(training) and float(dropout_p) > 0.0
    if apply_dropout and dropout_key is None:
        dropout_key = jax.random.PRNGKey(0)

    # Chunk size over T: largest divisor of T not exceeding t_chunk.
    tc = max(1, min(int(t_chunk), T))
    while T % tc != 0:
        tc -= 1
    n_chunks = T // tc

    # Glue: pre-transpose weights (row-major matmuls in-kernel), fold biases,
    # cast matmul operands to bf16 (W_hh stays f32; masked+cast in-kernel).
    w_ih_t = jnp.transpose(w_ih).astype(jnp.bfloat16)        # (D, 4H)
    w_hh_t = jnp.transpose(w_hh_raw).astype(jnp.float32)     # (H, 4H)
    b = (b_ih + b_hh).reshape(1, G).astype(jnp.float32)      # (1, 4H)
    x_b = x.astype(jnp.bfloat16)
    h0_f = h0.astype(jnp.float32)
    c0_f = c0.astype(jnp.float32)

    in_specs = []
    args = []
    if apply_dropout:
        u = _dropout_uniform(dropout_key, H, G)
        in_specs.append(pl.BlockSpec((H, G), lambda t: (0, 0)))
        args.append(u)
    in_specs += [
        pl.BlockSpec((tc, B, D), lambda t: (t, 0, 0)),   # x: streamed over T
        pl.BlockSpec((D, G), lambda t: (0, 0)),          # W_ih (resident)
        pl.BlockSpec((H, G), lambda t: (0, 0)),          # W_hh raw (resident)
        pl.BlockSpec((1, G), lambda t: (0, 0)),          # bias
        pl.BlockSpec((B, H), lambda t: (0, 0)),          # h0
        pl.BlockSpec((B, H), lambda t: (0, 0)),          # c0
    ]
    args += [x_b, w_ih_t, w_hh_t, b, h0_f, c0_f]

    out_shape = (
        jax.ShapeDtypeStruct((T, B, H), jnp.float32),    # output
        jax.ShapeDtypeStruct((B, H), jnp.float32),       # h_n
        jax.ShapeDtypeStruct((B, H), jnp.float32),       # c_n
    )
    out_specs = (
        pl.BlockSpec((tc, B, H), lambda t: (t, 0, 0)),
        pl.BlockSpec((B, H), lambda t: (0, 0)),
        pl.BlockSpec((B, H), lambda t: (0, 0)),
    )

    scratch_shapes = [
        pltpu.VMEM((H, G), jnp.bfloat16),    # masked recurrent weight (bf16)
        pltpu.VMEM((tc, B, G), jnp.float32), # chunk input projection
        pltpu.VMEM((B, H), jnp.float32),     # h state (carried across grid)
        pltpu.VMEM((B, H), jnp.float32),     # c state (carried across grid)
    ]

    est = _vmem_estimate_bytes(tc, B, D, H, apply_dropout)
    vmem_limit = int(min(max(2 * est, 16 * 1024 * 1024), 100 * 1024 * 1024))

    kernel = functools.partial(
        _wd_lstm_kernel, dropout_p=float(dropout_p), apply_dropout=apply_dropout)

    output, h_n, c_n = pl.pallas_call(
        kernel,
        out_shape=out_shape,
        grid=(n_chunks,),
        in_specs=in_specs,
        out_specs=out_specs,
        scratch_shapes=scratch_shapes,
        compiler_params=pltpu.CompilerParams(
            dimension_semantics=("arbitrary",),   # serial recurrence over T
            vmem_limit_bytes=vmem_limit,
        ),
    )(*args)

    return output, (h_n, c_n)


def _reference_forward(x, h0, c0, w_ih, w_hh_raw, b_ih, b_hh, *,
                       dropout_p, training, dropout_key):
    """Pure-JAX reference mirroring the kernel's math (bf16 operands, f32 accum)."""
    T, B, D = x.shape
    H = h0.shape[-1]
    G = 4 * H
    w_ih_t = jnp.transpose(w_ih).astype(jnp.bfloat16)
    w_hh_t = jnp.transpose(w_hh_raw).astype(jnp.float32)
    if training and dropout_p > 0.0:
        u = _dropout_uniform(dropout_key, H, G)
        keep = u >= jnp.float32(dropout_p)
        w_hh_t = jnp.where(keep, w_hh_t * (1.0 / (1.0 - dropout_p)), 0.0)
    w_hh_b = w_hh_t.astype(jnp.bfloat16)
    b = (b_ih + b_hh).reshape(1, G).astype(jnp.float32)

    xg = jnp.einsum("tbd,dg->tbg", x.astype(jnp.bfloat16), w_ih_t,
                    preferred_element_type=jnp.float32) + b

    def step(carry, g_t):
        h, c = carry
        gates = g_t + jnp.dot(h.astype(jnp.bfloat16), w_hh_b,
                              preferred_element_type=jnp.float32)
        i_g = jax.nn.sigmoid(gates[:, 0 * H:1 * H])
        f_g = jax.nn.sigmoid(gates[:, 1 * H:2 * H])
        g_g = jnp.tanh(gates[:, 2 * H:3 * H])
        o_g = jax.nn.sigmoid(gates[:, 3 * H:4 * H])
        c_new = f_g * c + i_g * g_g
        h_new = o_g * jnp.tanh(c_new)
        return (h_new, c_new), h_new

    (h_n, c_n), out = lax.scan(step, (h0.astype(jnp.float32), c0.astype(jnp.float32)), xg)
    return out, (h_n, c_n)


if __name__ == "__main__":
    # Small, TPU-layout-friendly shapes (H multiple of 128, B multiple of 8).
    T, B, D, H = 8, 8, 128, 128
    dropout_p = 0.5

    key = jax.random.PRNGKey(0)
    k_x, k_h, k_c, k_wi, k_wh, k_bi, k_bh, k_drop = jax.random.split(key, 8)

    # Parameter init like nn.LSTM: uniform(-1/sqrt(H), 1/sqrt(H)).
    bound = float(H) ** -0.5
    w_ih = jax.random.uniform(k_wi, (4 * H, D), jnp.float32, -bound, bound)
    w_hh_raw = jax.random.uniform(k_wh, (4 * H, H), jnp.float32, -bound, bound)  # weight_hh_l0_raw
    b_ih = jax.random.uniform(k_bi, (4 * H,), jnp.float32, -bound, bound)
    b_hh = jax.random.uniform(k_bh, (4 * H,), jnp.float32, -bound, bound)

    x = jax.random.normal(k_x, (T, B, D), jnp.float32)
    h0 = jax.random.normal(k_h, (B, H), jnp.float32)
    c0 = jax.random.normal(k_c, (B, H), jnp.float32)

    # Training-mode forward (weight dropout active, mask fixed by k_drop for this call).
    out, (h_n, c_n) = weight_drop_lstm_forward(
        x, h0, c0, w_ih, w_hh_raw, b_ih, b_hh,
        dropout_p=dropout_p, training=True, dropout_key=k_drop, t_chunk=4)
    jax.block_until_ready((out, h_n, c_n))

    ref_out, (ref_h, ref_c) = _reference_forward(
        x, h0, c0, w_ih, w_hh_raw, b_ih, b_hh,
        dropout_p=dropout_p, training=True, dropout_key=k_drop)
    np.testing.assert_allclose(np.asarray(out), np.asarray(ref_out), rtol=3e-2, atol=3e-2)
    np.testing.assert_allclose(np.asarray(h_n), np.asarray(ref_h), rtol=3e-2, atol=3e-2)
    np.testing.assert_allclose(np.asarray(c_n), np.asarray(ref_c), rtol=3e-2, atol=3e-2)

    # Eval-mode forward (F.dropout identity path; no uniforms input, no mask work).
    out_e, (h_e, c_e) = weight_drop_lstm_forward(
        x, h0, c0, w_ih, w_hh_raw, b_ih, b_hh,
        dropout_p=dropout_p, training=False, t_chunk=4)
    jax.block_until_ready((out_e, h_e, c_e))

    ref_oe, (ref_he, ref_ce) = _reference_forward(
        x, h0, c0, w_ih, w_hh_raw, b_ih, b_hh,
        dropout_p=dropout_p, training=False, dropout_key=None)
    np.testing.assert_allclose(np.asarray(out_e), np.asarray(ref_oe), rtol=3e-2, atol=3e-2)

    assert out.shape == (T, B, H) and h_n.shape == (B, H) and c_n.shape == (B, H)
    assert np.all(np.isfinite(np.asarray(out)))
    print("KERNEL_OK")
</pallas_src>

<mosaic_0001>
module attributes {stable_mosaic.version = 11 : i64} {
  func.func @_wd_lstm_kernel(%arg0: i32, %arg1: memref<128x512xf32, #tpu.memory_space<vmem>>, %arg2: memref<4x8x128xbf16, #tpu.memory_space<vmem>>, %arg3: memref<128x512xbf16, #tpu.memory_space<vmem>>, %arg4: memref<128x512xf32, #tpu.memory_space<vmem>>, %arg5: memref<1x512xf32, #tpu.memory_space<vmem>>, %arg6: memref<8x128xf32, #tpu.memory_space<vmem>>, %arg7: memref<8x128xf32, #tpu.memory_space<vmem>>, %arg8: memref<4x8x128xf32, #tpu.memory_space<vmem>>, %arg9: memref<8x128xf32, #tpu.memory_space<vmem>>, %arg10: memref<8x128xf32, #tpu.memory_space<vmem>>, %arg11: memref<128x512xbf16, #tpu.memory_space<vmem>>, %arg12: memref<4x8x512xf32, #tpu.memory_space<vmem>>, %arg13: memref<8x128xf32, #tpu.memory_space<vmem>>, %arg14: memref<8x128xf32, #tpu.memory_space<vmem>>) attributes {dimension_semantics = [#tpu.dimension_semantics<arbitrary>], iteration_bounds = array<i64: 2>, scalar_prefetch = 0 : i64, scratch_operands = 4 : i64, tpu.core_type = #tpu.core_type<tc>, window_params = [{pipeline_mode = #tpu.pipeline_mode<synchronous>, transform_indices = @transform_0, window_bounds = array<i64: 128, 512>}, {transform_indices = @transform_1, window_bounds = array<i64: 4, 8, 128>}, {pipeline_mode = #tpu.pipeline_mode<synchronous>, transform_indices = @transform_2, window_bounds = array<i64: 128, 512>}, {pipeline_mode = #tpu.pipeline_mode<synchronous>, transform_indices = @transform_3, window_bounds = array<i64: 128, 512>}, {pipeline_mode = #tpu.pipeline_mode<synchronous>, transform_indices = @transform_4, window_bounds = array<i64: 1, 512>}, {pipeline_mode = #tpu.pipeline_mode<synchronous>, transform_indices = @transform_5, window_bounds = array<i64: 8, 128>}, {pipeline_mode = #tpu.pipeline_mode<synchronous>, transform_indices = @transform_6, window_bounds = array<i64: 8, 128>}, {transform_indices = @transform_7, window_bounds = array<i64: 4, 8, 128>}, {pipeline_mode = #tpu.pipeline_mode<synchronous>, transform_indices = @transform_8, window_bounds = array<i64: 8, 128>}, {pipeline_mode = #tpu.pipeline_mode<synchronous>, transform_indices = @transform_9, window_bounds = array<i64: 8, 128>}]} {
    %c0_i32 = arith.constant 0 : i32
    %0 = arith.cmpi eq, %arg0, %c0_i32 : i32
    %1 = arith.extui %0 : i1 to i32
    %c0_i32_0 = arith.constant 0 : i32
    %2 = arith.cmpi ne, %1, %c0_i32_0 : i32
    scf.if %2 {
      %c0_89 = arith.constant 0 : index
      %c0_90 = arith.constant 0 : index
      %165 = vector.load %arg1[%c0_89, %c0_90] : memref<128x512xf32, #tpu.memory_space<vmem>>, vector<128x512xf32>
      %cst_91 = arith.constant 5.000000e-01 : f32
      %166 = vector.broadcast %cst_91 : f32 to vector<128x512xf32>
      %167 = arith.cmpf oge, %165, %166 : vector<128x512xf32>
      %c0_92 = arith.constant 0 : index
      %c0_93 = arith.constant 0 : index
      %168 = vector.load %arg4[%c0_92, %c0_93] : memref<128x512xf32, #tpu.memory_space<vmem>>, vector<128x512xf32>
      %cst_94 = arith.constant 2.000000e+00 : f32
      %169 = vector.broadcast %cst_94 : f32 to vector<128x512xf32>
      %170 = arith.mulf %168, %169 : vector<128x512xf32>
      %cst_95 = arith.constant 0.000000e+00 : f32
      %171 = vector.broadcast %cst_95 : f32 to vector<128x512xf32>
      %172 = arith.select %167, %170, %171 : vector<128x512xi1>, vector<128x512xf32>
      %173 = arith.truncf %172 : vector<128x512xf32> to vector<128x512xbf16>
      %c0_96 = arith.constant 0 : index
      %c0_97 = arith.constant 0 : index
      %174 = vector.load %arg11[%c0_96, %c0_97] : memref<128x512xbf16, #tpu.memory_space<vmem>>, vector<128x512xbf16>
      tpu.vector_store %arg11[%c0_96, %c0_97], %173 {strides = array<i32>} : memref<128x512xbf16, #tpu.memory_space<vmem>>, vector<128x512xbf16>,
      %c0_98 = arith.constant 0 : index
      %c0_99 = arith.constant 0 : index
      %175 = vector.load %arg6[%c0_98, %c0_99] : memref<8x128xf32, #tpu.memory_space<vmem>>, vector<8x128xf32>
      %c0_100 = arith.constant 0 : index
      %c0_101 = arith.constant 0 : index
      %176 = vector.load %arg13[%c0_100, %c0_101] : memref<8x128xf32, #tpu.memory_space<vmem>>, vector<8x128xf32>
      tpu.vector_store %arg13[%c0_100, %c0_101], %175 {strides = array<i32>} : memref<8x128xf32, #tpu.memory_space<vmem>>, vector<8x128xf32>,
      %c0_102 = arith.constant 0 : index
      %c0_103 = arith.constant 0 : index
      %177 = vector.load %arg7[%c0_102, %c0_103] : memref<8x128xf32, #tpu.memory_space<vmem>>, vector<8x128xf32>
      %c0_104 = arith.constant 0 : index
      %c0_105 = arith.constant 0 : index
      %178 = vector.load %arg14[%c0_104, %c0_105] : memref<8x128xf32, #tpu.memory_space<vmem>>, vector<8x128xf32>
      tpu.vector_store %arg14[%c0_104, %c0_105], %177 {strides = array<i32>} : memref<8x128xf32, #tpu.memory_space<vmem>>, vector<8x128xf32>,
    } else {
    }
    %c0 = arith.constant 0 : index
    %c0_1 = arith.constant 0 : index
    %c0_2 = arith.constant 0 : index
    %3 = vector.load %arg2[%c0, %c0_1, %c0_2] : memref<4x8x128xbf16, #tpu.memory_space<vmem>>, vector<4x8x128xbf16>
    %4 = vector.shape_cast %3 : vector<4x8x128xbf16> to vector<32x128xbf16>
    %c0_3 = arith.constant 0 : index
    %c0_4 = arith.constant 0 : index
    %5 = vector.load %arg3[%c0_3, %c0_4] : memref<128x512xbf16, #tpu.memory_space<vmem>>, vector<128x512xbf16>
    %cst = arith.constant dense<0.000000e+00> : vector<32x512xf32>
    %6 = tpu.matmul %4, %5, %cst {dimension_numbers = #tpu.dot_dimension_numbers<[1], [0], [0], [1], [0, 0, 1, 1], [], []>} : vector<32x128xbf16>, vector<128x512xbf16>, vector<32x512xf32> -> vector<32x512xf32>
    %c0_5 = arith.constant 0 : index
    %c0_6 = arith.constant 0 : index
    %7 = vector.load %arg5[%c0_5, %c0_6] : memref<1x512xf32, #tpu.memory_space<vmem>>, vector<1x512xf32>
    %8 = vector.broadcast %7 : vector<1x512xf32> to vector<32x512xf32>
    %9 = arith.addf %6, %8 : vector<32x512xf32>
    %10 = vector.shape_cast %9 : vector<32x512xf32> to vector<4x8x512xf32>
    %c0_7 = arith.constant 0 : index
    %c0_8 = arith.constant 0 : index
    %c0_9 = arith.constant 0 : index
    %11 = vector.load %arg12[%c0_7, %c0_8, %c0_9] : memref<4x8x512xf32, #tpu.memory_space<vmem>>, vector<4x8x512xf32>
    tpu.vector_store %arg12[%c0_7, %c0_8, %c0_9], %10 {strides = array<i32>} : memref<4x8x512xf32, #tpu.memory_space<vmem>>, vector<4x8x512xf32>,
    %c0_10 = arith.constant 0 : index
    %c0_11 = arith.constant 0 : index
    %12 = vector.load %arg11[%c0_10, %c0_11] : memref<128x512xbf16, #tpu.memory_space<vmem>>, vector<128x512xbf16>
    %c0_12 = arith.constant 0 : index
    %c0_13 = arith.constant 0 : index
    %13 = vector.load %arg13[%c0_12, %c0_13] : memref<8x128xf32, #tpu.memory_space<vmem>>, vector<8x128xf32>
    %14 = arith.truncf %13 : vector<8x128xf32> to vector<8x128xbf16>
    %c0_14 = arith.constant 0 : index
    %c0_15 = arith.constant 0 : index
    %c0_16 = arith.constant 0 : index
    %15 = vector.load %arg12[%c0_14, %c0_15, %c0_16] : memref<4x8x512xf32, #tpu.memory_space<vmem>>, vector<1x8x512xf32>
    %16 = vector.shape_cast %15 : vector<1x8x512xf32> to vector<8x512xf32>
    %cst_17 = arith.constant dense<0.000000e+00> : vector<8x512xf32>
    %17 = tpu.matmul %14, %12, %cst_17 {dimension_numbers = #tpu.dot_dimension_numbers<[1], [0], [0], [1], [0, 0, 1, 1], [], []>} : vector<8x128xbf16>, vector<128x512xbf16>, vector<8x512xf32> -> vector<8x512xf32>
    %18 = arith.addf %16, %17 : vector<8x512xf32>
    %19 = vector.extract_strided_slice %18 {offsets = [0, 0], sizes = [8, 128], strides = [1, 1]} : vector<8x512xf32> to vector<8x128xf32>
    %20 = arith.negf %19 : vector<8x128xf32>
    %21 = math.exp %20 : vector<8x128xf32>
    %cst_18 = arith.constant 1.000000e+00 : f32
    %22 = vector.broadcast %cst_18 : f32 to vector<8x128xf32>
    %23 = arith.addf %22, %21 : vector<8x128xf32>
    %24 = arith.divf %22, %23 : vector<8x128xf32>
    %25 = vector.extract_strided_slice %18 {offsets = [0, 128], sizes = [8, 128], strides = [1, 1]} : vector<8x512xf32> to vector<8x128xf32>
    %26 = arith.negf %25 : vector<8x128xf32>
    %27 = math.exp %26 : vector<8x128xf32>
    %cst_19 = arith.constant 1.000000e+00 : f32
    %28 = vector.broadcast %cst_19 : f32 to vector<8x128xf32>
    %29 = arith.addf %28, %27 : vector<8x128xf32>
    %30 = arith.divf %28, %29 : vector<8x128xf32>
    %31 = vector.extract_strided_slice %18 {offsets = [0, 256], sizes = [8, 128], strides = [1, 1]} : vector<8x512xf32> to vector<8x128xf32>
    %32 = math.tanh %31 : vector<8x128xf32>
    %33 = vector.extract_strided_slice %18 {offsets = [0, 384], sizes = [8, 128], strides = [1, 1]} : vector<8x512xf32> to vector<8x128xf32>
    %34 = arith.negf %33 : vector<8x128xf32>
    %35 = math.exp %34 : vector<8x128xf32>
    %cst_20 = arith.constant 1.000000e+00 : f32
    %36 = vector.broadcast %cst_20 : f32 to vector<8x128xf32>
    %37 = arith.addf %36, %35 : vector<8x128xf32>
    %38 = arith.divf %36, %37 : vector<8x128xf32>
    %c0_21 = arith.constant 0 : index
    %c0_22 = arith.constant 0 : index
    %39 = vector.load %arg14[%c0_21, %c0_22] : memref<8x128xf32, #tpu.memory_space<vmem>>, vector<8x128xf32>
    %40 = arith.mulf %30, %39 : vector<8x128xf32>
    %41 = arith.mulf %24, %32 : vector<8x128xf32>
    %42 = arith.addf %40, %41 : vector<8x128xf32>
    %43 = math.tanh %42 : vector<8x128xf32>
    %44 = arith.mulf %38, %43 : vector<8x128xf32>
    %c0_23 = arith.constant 0 : index
    %c0_24 = arith.constant 0 : index
    %45 = vector.load %arg14[%c0_23, %c0_24] : memref<8x128xf32, #tpu.memory_space<vmem>>, vector<8x128xf32>
    tpu.vector_store %arg14[%c0_23, %c0_24], %42 {strides = array<i32>} : memref<8x128xf32, #tpu.memory_space<vmem>>, vector<8x128xf32>,
    %c0_25 = arith.constant 0 : index
    %c0_26 = arith.constant 0 : index
    %46 = vector.load %arg13[%c0_25, %c0_26] : memref<8x128xf32, #tpu.memory_space<vmem>>, vector<8x128xf32>
    tpu.vector_store %arg13[%c0_25, %c0_26], %44 {strides = array<i32>} : memref<8x128xf32, #tpu.memory_space<vmem>>, vector<8x128xf32>,
    %c0_27 = arith.constant 0 : index
    %c0_28 = arith.constant 0 : index
    %c0_29 = arith.constant 0 : index
    %47 = vector.load %arg8[%c0_27, %c0_28, %c0_29] : memref<4x8x128xf32, #tpu.memory_space<vmem>>, vector<1x8x128xf32>
    %48 = vector.shape_cast %47 : vector<1x8x128xf32> to vector<8x128xf32>
    %49 = vector.shape_cast %44 : vector<8x128xf32> to vector<1x8x128xf32>
    tpu.vector_store %arg8[%c0_27, %c0_28, %c0_29], %49 {strides = array<i32>} : memref<4x8x128xf32, #tpu.memory_space<vmem>>, vector<1x8x128xf32>,
    %c0_30 = arith.constant 0 : index
    %c0_31 = arith.constant 0 : index
    %50 = vector.load %arg13[%c0_30, %c0_31] : memref<8x128xf32, #tpu.memory_space<vmem>>, vector<8x128xf32>
    %51 = arith.truncf %50 : vector<8x128xf32> to vector<8x128xbf16>
    %c1 = arith.constant 1 : index
    %c0_32 = arith.constant 0 : index
    %c0_33 = arith.constant 0 : index
    %52 = vector.load %arg12[%c1, %c0_32, %c0_33] : memref<4x8x512xf32, #tpu.memory_space<vmem>>, vector<1x8x512xf32>
    %53 = vector.shape_cast %52 : vector<1x8x512xf32> to vector<8x512xf32>
    %cst_34 = arith.constant dense<0.000000e+00> : vector<8x512xf32>
    %54 = tpu.matmul %51, %12, %cst_34 {dimension_numbers = #tpu.dot_dimension_numbers<[1], [0], [0], [1], [0, 0, 1, 1], [], []>} : vector<8x128xbf16>, vector<128x512xbf16>, vector<8x512xf32> -> vector<8x512xf32>
    %55 = arith.addf %53, %54 : vector<8x512xf32>
    %56 = vector.extract_strided_slice %55 {offsets = [0, 0], sizes = [8, 128], strides = [1, 1]} : vector<8x512xf32> to vector<8x128xf32>
    %57 = arith.negf %56 : vector<8x128xf32>
    %58 = math.exp %57 : vector<8x128xf32>
    %cst_35 = arith.constant 1.000000e+00 : f32
    %59 = vector.broadcast %cst_35 : f32 to vector<8x128xf32>
    %60 = arith.addf %59, %58 : vector<8x128xf32>
    %61 = arith.divf %59, %60 : vector<8x128xf32>
    %62 = vector.extract_strided_slice %55 {offsets = [0, 128], sizes = [8, 128], strides = [1, 1]} : vector<8x512xf32> to vector<8x128xf32>
    %63 = arith.negf %62 : vector<8x128xf32>
    %64 = math.exp %63 : vector<8x128xf32>
    %cst_36 = arith.constant 1.000000e+00 : f32
    %65 = vector.broadcast %cst_36 : f32 to vector<8x128xf32>
    %66 = arith.addf %65, %64 : vector<8x128xf32>
    %67 = arith.divf %65, %66 : vector<8x128xf32>
    %68 = vector.extract_strided_slice %55 {offsets = [0, 256], sizes = [8, 128], strides = [1, 1]} : vector<8x512xf32> to vector<8x128xf32>
    %69 = math.tanh %68 : vector<8x128xf32>
    %70 = vector.extract_strided_slice %55 {offsets = [0, 384], sizes = [8, 128], strides = [1, 1]} : vector<8x512xf32> to vector<8x128xf32>
    %71 = arith.negf %70 : vector<8x128xf32>
    %72 = math.exp %71 : vector<8x128xf32>
    %cst_37 = arith.constant 1.000000e+00 : f32
    %73 = vector.broadcast %cst_37 : f32 to vector<8x128xf32>
    %74 = arith.addf %73, %72 : vector<8x128xf32>
    %75 = arith.divf %73, %74 : vector<8x128xf32>
    %c0_38 = arith.constant 0 : index
    %c0_39 = arith.constant 0 : index
    %76 = vector.load %arg14[%c0_38, %c0_39] : memref<8x128xf32, #tpu.memory_space<vmem>>, vector<8x128xf32>
    %77 = arith.mulf %67, %76 : vector<8x128xf32>
    %78 = arith.mulf %61, %69 : vector<8x128xf32>
    %79 = arith.addf %77, %78 : vector<8x128xf32>
    %80 = math.tanh %79 : vector<8x128xf32>
    %81 = arith.mulf %75, %80 : vector<8x128xf32>
    %c0_40 = arith.constant 0 : index
    %c0_41 = arith.constant 0 : index
    %82 = vector.load %arg14[%c0_40, %c0_41] : memref<8x128xf32, #tpu.memory_space<vmem>>, vector<8x128xf32>
    tpu.vector_store %arg14[%c0_40, %c0_41], %79 {strides = array<i32>} : memref<8x128xf32, #tpu.memory_space<vmem>>, vector<8x128xf32>,
    %c0_42 = arith.constant 0 : index
    %c0_43 = arith.constant 0 : index
    %83 = vector.load %arg13[%c0_42, %c0_43] : memref<8x128xf32, #tpu.memory_space<vmem>>, vector<8x128xf32>
    tpu.vector_store %arg13[%c0_42, %c0_43], %81 {strides = array<i32>} : memref<8x128xf32, #tpu.memory_space<vmem>>, vector<8x128xf32>,
    %c1_44 = arith.constant 1 : index
    %c0_45 = arith.constant 0 : index
    %c0_46 = arith.constant 0 : index
    %84 = vector.load %arg8[%c1_44, %c0_45, %c0_46] : memref<4x8x128xf32, #tpu.memory_space<vmem>>, vector<1x8x128xf32>
    %85 = vector.shape_cast %84 : vector<1x8x128xf32> to vector<8x128xf32>
    %86 = vector.shape_cast %81 : vector<8x128xf32> to vector<1x8x128xf32>
    tpu.vector_store %arg8[%c1_44, %c0_45, %c0_46], %86 {strides = array<i32>} : memref<4x8x128xf32, #tpu.memory_space<vmem>>, vector<1x8x128xf32>,
    %c0_47 = arith.constant 0 : index
    %c0_48 = arith.constant 0 : index
    %87 = vector.load %arg13[%c0_47, %c0_48] : memref<8x128xf32, #tpu.memory_space<vmem>>, vector<8x128xf32>
    %88 = arith.truncf %87 : vector<8x128xf32> to vector<8x128xbf16>
    %c2 = arith.constant 2 : index
    %c0_49 = arith.constant 0 : index
    %c0_50 = arith.constant 0 : index
    %89 = vector.load %arg12[%c2, %c0_49, %c0_50] : memref<4x8x512xf32, #tpu.memory_space<vmem>>, vector<1x8x512xf32>
    %90 = vector.shape_cast %89 : vector<1x8x512xf32> to vector<8x512xf32>
    %cst_51 = arith.constant dense<0.000000e+00> : vector<8x512xf32>
    %91 = tpu.matmul %88, %12, %cst_51 {dimension_numbers = #tpu.dot_dimension_numbers<[1], [0], [0], [1], [0, 0, 1, 1], [], []>} : vector<8x128xbf16>, vector<128x512xbf16>, vector<8x512xf32> -> vector<8x512xf32>
    %92 = arith.addf %90, %91 : vector<8x512xf32>
    %93 = vector.extract_strided_slice %92 {offsets = [0, 0], sizes = [8, 128], strides = [1, 1]} : vector<8x512xf32> to vector<8x128xf32>
    %94 = arith.negf %93 : vector<8x128xf32>
    %95 = math.exp %94 : vector<8x128xf32>
    %cst_52 = arith.constant 1.000000e+00 : f32
    %96 = vector.broadcast %cst_52 : f32 to vector<8x128xf32>
    %97 = arith.addf %96, %95 : vector<8x128xf32>
    %98 = arith.divf %96, %97 : vector<8x128xf32>
    %99 = vector.extract_strided_slice %92 {offsets = [0, 128], sizes = [8, 128], strides = [1, 1]} : vector<8x512xf32> to vector<8x128xf32>
    %100 = arith.negf %99 : vector<8x128xf32>
    %101 = math.exp %100 : vector<8x128xf32>
    %cst_53 = arith.constant 1.000000e+00 : f32
    %102 = vector.broadcast %cst_53 : f32 to vector<8x128xf32>
    %103 = arith.addf %102, %101 : vector<8x128xf32>
    %104 = arith.divf %102, %103 : vector<8x128xf32>
    %105 = vector.extract_strided_slice %92 {offsets = [0, 256], sizes = [8, 128], strides = [1, 1]} : vector<8x512xf32> to vector<8x128xf32>
    %106 = math.tanh %105 : vector<8x128xf32>
    %107 = vector.extract_strided_slice %92 {offsets = [0, 384], sizes = [8, 128], strides = [1, 1]} : vector<8x512xf32> to vector<8x128xf32>
    %108 = arith.negf %107 : vector<8x128xf32>
    %109 = math.exp %108 : vector<8x128xf32>
    %cst_54 = arith.constant 1.000000e+00 : f32
    %110 = vector.broadcast %cst_54 : f32 to vector<8x128xf32>
    %111 = arith.addf %110, %109 : vector<8x128xf32>
    %112 = arith.divf %110, %111 : vector<8x128xf32>
    %c0_55 = arith.constant 0 : index
    %c0_56 = arith.constant 0 : index
    %113 = vector.load %arg14[%c0_55, %c0_56] : memref<8x128xf32, #tpu.memory_space<vmem>>, vector<8x128xf32>
    %114 = arith.mulf %104, %113 : vector<8x128xf32>
    %115 = arith.mulf %98, %106 : vector<8x128xf32>
    %116 = arith.addf %114, %115 : vector<8x128xf32>
    %117 = math.tanh %116 : vector<8x128xf32>
    %118 = arith.mulf %112, %117 : vector<8x128xf32>
    %c0_57 = arith.constant 0 : index
    %c0_58 = arith.constant 0 : index
    %119 = vector.load %arg14[%c0_57, %c0_58] : memref<8x128xf32, #tpu.memory_space<vmem>>, vector<8x128xf32>
    tpu.vector_store %arg14[%c0_57, %c0_58], %116 {strides = array<i32>} : memref<8x128xf32, #tpu.memory_space<vmem>>, vector<8x128xf32>,
    %c0_59 = arith.constant 0 : index
    %c0_60 = arith.constant 0 : index
    %120 = vector.load %arg13[%c0_59, %c0_60] : memref<8x128xf32, #tpu.memory_space<vmem>>, vector<8x128xf32>
    tpu.vector_store %arg13[%c0_59, %c0_60], %118 {strides = array<i32>} : memref<8x128xf32, #tpu.memory_space<vmem>>, vector<8x128xf32>,
    %c2_61 = arith.constant 2 : index
    %c0_62 = arith.constant 0 : index
    %c0_63 = arith.constant 0 : index
    %121 = vector.load %arg8[%c2_61, %c0_62, %c0_63] : memref<4x8x128xf32, #tpu.memory_space<vmem>>, vector<1x8x128xf32>
    %122 = vector.shape_cast %121 : vector<1x8x128xf32> to vector<8x128xf32>
    %123 = vector.shape_cast %118 : vector<8x128xf32> to vector<1x8x128xf32>
    tpu.vector_store %arg8[%c2_61, %c0_62, %c0_63], %123 {strides = array<i32>} : memref<4x8x128xf32, #tpu.memory_space<vmem>>, vector<1x8x128xf32>,
    %c0_64 = arith.constant 0 : index
    %c0_65 = arith.constant 0 : index
    %124 = vector.load %arg13[%c0_64, %c0_65] : memref<8x128xf32, #tpu.memory_space<vmem>>, vector<8x128xf32>
    %125 = arith.truncf %124 : vector<8x128xf32> to vector<8x128xbf16>
    %c3 = arith.constant 3 : index
    %c0_66 = arith.constant 0 : index
    %c0_67 = arith.constant 0 : index
    %126 = vector.load %arg12[%c3, %c0_66, %c0_67] : memref<4x8x512xf32, #tpu.memory_space<vmem>>, vector<1x8x512xf32>
    %127 = vector.shape_cast %126 : vector<1x8x512xf32> to vector<8x512xf32>
    %cst_68 = arith.constant dense<0.000000e+00> : vector<8x512xf32>
    %128 = tpu.matmul %125, %12, %cst_68 {dimension_numbers = #tpu.dot_dimension_numbers<[1], [0], [0], [1], [0, 0, 1, 1], [], []>} : vector<8x128xbf16>, vector<128x512xbf16>, vector<8x512xf32> -> vector<8x512xf32>
    %129 = arith.addf %127, %128 : vector<8x512xf32>
    %130 = vector.extract_strided_slice %129 {offsets = [0, 0], sizes = [8, 128], strides = [1, 1]} : vector<8x512xf32> to vector<8x128xf32>
    %131 = arith.negf %130 : vector<8x128xf32>
    %132 = math.exp %131 : vector<8x128xf32>
    %cst_69 = arith.constant 1.000000e+00 : f32
    %133 = vector.broadcast %cst_69 : f32 to vector<8x128xf32>
    %134 = arith.addf %133, %132 : vector<8x128xf32>
    %135 = arith.divf %133, %134 : vector<8x128xf32>
    %136 = vector.extract_strided_slice %129 {offsets = [0, 128], sizes = [8, 128], strides = [1, 1]} : vector<8x512xf32> to vector<8x128xf32>
    %137 = arith.negf %136 : vector<8x128xf32>
    %138 = math.exp %137 : vector<8x128xf32>
    %cst_70 = arith.constant 1.000000e+00 : f32
    %139 = vector.broadcast %cst_70 : f32 to vector<8x128xf32>
    %140 = arith.addf %139, %138 : vector<8x128xf32>
    %141 = arith.divf %139, %140 : vector<8x128xf32>
    %142 = vector.extract_strided_slice %129 {offsets = [0, 256], sizes = [8, 128], strides = [1, 1]} : vector<8x512xf32> to vector<8x128xf32>
    %143 = math.tanh %142 : vector<8x128xf32>
    %144 = vector.extract_strided_slice %129 {offsets = [0, 384], sizes = [8, 128], strides = [1, 1]} : vector<8x512xf32> to vector<8x128xf32>
    %145 = arith.negf %144 : vector<8x128xf32>
    %146 = math.exp %145 : vector<8x128xf32>
    %cst_71 = arith.constant 1.000000e+00 : f32
    %147 = vector.broadcast %cst_71 : f32 to vector<8x128xf32>
    %148 = arith.addf %147, %146 : vector<8x128xf32>
    %149 = arith.divf %147, %148 : vector<8x128xf32>
    %c0_72 = arith.constant 0 : index
    %c0_73 = arith.constant 0 : index
    %150 = vector.load %arg14[%c0_72, %c0_73] : memref<8x128xf32, #tpu.memory_space<vmem>>, vector<8x128xf32>
    %151 = arith.mulf %141, %150 : vector<8x128xf32>
    %152 = arith.mulf %135, %143 : vector<8x128xf32>
    %153 = arith.addf %151, %152 : vector<8x128xf32>
    %154 = math.tanh %153 : vector<8x128xf32>
    %155 = arith.mulf %149, %154 : vector<8x128xf32>
    %c0_74 = arith.constant 0 : index
    %c0_75 = arith.constant 0 : index
    %156 = vector.load %arg14[%c0_74, %c0_75] : memref<8x128xf32, #tpu.memory_space<vmem>>, vector<8x128xf32>
    tpu.vector_store %arg14[%c0_74, %c0_75], %153 {strides = array<i32>} : memref<8x128xf32, #tpu.memory_space<vmem>>, vector<8x128xf32>,
    %c0_76 = arith.constant 0 : index
    %c0_77 = arith.constant 0 : index
    %157 = vector.load %arg13[%c0_76, %c0_77] : memref<8x128xf32, #tpu.memory_space<vmem>>, vector<8x128xf32>
    tpu.vector_store %arg13[%c0_76, %c0_77], %155 {strides = array<i32>} : memref<8x128xf32, #tpu.memory_space<vmem>>, vector<8x128xf32>,
    %c3_78 = arith.constant 3 : index
    %c0_79 = arith.constant 0 : index
    %c0_80 = arith.constant 0 : index
    %158 = vector.load %arg8[%c3_78, %c0_79, %c0_80] : memref<4x8x128xf32, #tpu.memory_space<vmem>>, vector<1x8x128xf32>
    %159 = vector.shape_cast %158 : vector<1x8x128xf32> to vector<8x128xf32>
    %160 = vector.shape_cast %155 : vector<8x128xf32> to vector<1x8x128xf32>
    tpu.vector_store %arg8[%c3_78, %c0_79, %c0_80], %160 {strides = array<i32>} : memref<4x8x128xf32, #tpu.memory_space<vmem>>, vector<1x8x128xf32>,
    %c0_81 = arith.constant 0 : index
    %c0_82 = arith.constant 0 : index
    %161 = vector.load %arg13[%c0_81, %c0_82] : memref<8x128xf32, #tpu.memory_space<vmem>>, vector<8x128xf32>
    %c0_83 = arith.constant 0 : index
    %c0_84 = arith.constant 0 : index
    %162 = vector.load %arg9[%c0_83, %c0_84] : memref<8x128xf32, #tpu.memory_space<vmem>>, vector<8x128xf32>
    tpu.vector_store %arg9[%c0_83, %c0_84], %161 {strides = array<i32>} : memref<8x128xf32, #tpu.memory_space<vmem>>, vector<8x128xf32>,
    %c0_85 = arith.constant 0 : index
    %c0_86 = arith.constant 0 : index
    %163 = vector.load %arg14[%c0_85, %c0_86] : memref<8x128xf32, #tpu.memory_space<vmem>>, vector<8x128xf32>
    %c0_87 = arith.constant 0 : index
    %c0_88 = arith.constant 0 : index
    %164 = vector.load %arg10[%c0_87, %c0_88] : memref<8x128xf32, #tpu.memory_space<vmem>>, vector<8x128xf32>
    tpu.vector_store %arg10[%c0_87, %c0_88], %163 {strides = array<i32>} : memref<8x128xf32, #tpu.memory_space<vmem>>, vector<8x128xf32>,
    return
  }
  func.func @transform_0(%arg0: i32) -> (i32, i32) {
    %c0_i32 = arith.constant 0 : i32
    %c0_i32_0 = arith.constant 0 : i32
    %c0_i32_1 = arith.constant 0 : i32
    return %c0_i32, %c0_i32_0 : i32, i32
  }
  func.func @transform_1(%arg0: i32) -> (i32, i32, i32) {
    %c0_i32 = arith.constant 0 : i32
    %c0_i32_0 = arith.constant 0 : i32
    %c0_i32_1 = arith.constant 0 : i32
    return %arg0, %c0_i32, %c0_i32_0 : i32, i32, i32
  }
  func.func @transform_2(%arg0: i32) -> (i32, i32) {
    %c0_i32 = arith.constant 0 : i32
    %c0_i32_0 = arith.constant 0 : i32
    %c0_i32_1 = arith.constant 0 : i32
    return %c0_i32, %c0_i32_0 : i32, i32
  }
  func.func @transform_3(%arg0: i32) -> (i32, i32) {
    %c0_i32 = arith.constant 0 : i32
    %c0_i32_0 = arith.constant 0 : i32
    %c0_i32_1 = arith.constant 0 : i32
    return %c0_i32, %c0_i32_0 : i32, i32
  }
  func.func @transform_4(%arg0: i32) -> (i32, i32) {
    %c0_i32 = arith.constant 0 : i32
    %c0_i32_0 = arith.constant 0 : i32
    %c0_i32_1 = arith.constant 0 : i32
    return %c0_i32, %c0_i32_0 : i32, i32
  }
  func.func @transform_5(%arg0: i32) -> (i32, i32) {
    %c0_i32 = arith.constant 0 : i32
    %c0_i32_0 = arith.constant 0 : i32
    %c0_i32_1 = arith.constant 0 : i32
    return %c0_i32, %c0_i32_0 : i32, i32
  }
  func.func @transform_6(%arg0: i32) -> (i32, i32) {
    %c0_i32 = arith.constant 0 : i32
    %c0_i32_0 = arith.constant 0 : i32
    %c0_i32_1 = arith.constant 0 : i32
    return %c0_i32, %c0_i32_0 : i32, i32
  }
  func.func @transform_7(%arg0: i32) -> (i32, i32, i32) {
    %c0_i32 = arith.constant 0 : i32
    %c0_i32_0 = arith.constant 0 : i32
    %c0_i32_1 = arith.constant 0 : i32
    return %arg0, %c0_i32, %c0_i32_0 : i32, i32, i32
  }
  func.func @transform_8(%arg0: i32) -> (i32, i32) {
    %c0_i32 = arith.constant 0 : i32
    %c0_i32_0 = arith.constant 0 : i32
    %c0_i32_1 = arith.constant 0 : i32
    return %c0_i32, %c0_i32_0 : i32, i32
  }
  func.func @transform_9(%arg0: i32) -> (i32, i32) {
    %c0_i32 = arith.constant 0 : i32
    %c0_i32_0 = arith.constant 0 : i32
    %c0_i32_1 = arith.constant 0 : i32
    return %c0_i32, %c0_i32_0 : i32, i32
  }
}

</mosaic_0001>

<bundles_post_ra>
// kernel: tpu_custom_call.1
= control target key start
LH: loop header
LB: loop body
LE: loop exit
PB: predicated region body
PF: predicated region fallthrough
CT: control target
= control target key end

     0   :  { %s3120_s0 = inlined_call_operand.hbm [shape: f32[128,512], index: 0, kind: input, shape index: {}]   ;;  %s3121_s1 = inlined_call_operand.hbm [shape: bf16[8,8,128], index: 1, kind: input, shape index: {}]   ;;  %s3122_s2 = inlined_call_operand.hbm [shape: bf16[128,512], index: 2, kind: input, shape index: {}]   ;;  %s3123_s3 = inlined_call_operand.hbm [shape: f32[128,512], index: 3, kind: input, shape index: {}]   ;;  %s3124_s4 = inlined_call_operand.hbm [shape: f32[1,512], index: 4, kind: input, shape index: {}]   ;;  %s3125_s5 = inlined_call_operand.vmem [shape: f32[8,128], index: 5, kind: input, shape index: {}]   ;;  %s3126_s6 = inlined_call_operand.vmem [shape: f32[8,128], index: 6, kind: input, shape index: {}]   ;;  %s3127_s7 = inlined_call_operand.hbm [shape: f32[8,8,128], index: 7, kind: output, shape index: {0}]   ;;  %s3128_s8 = inlined_call_operand.hbm [shape: f32[8,128], index: 8, kind: output, shape index: {1}]   ;;  %s3129_s9 = inlined_call_operand.hbm [shape: f32[8,128], index: 9, kind: output, shape index: {2}]  }
   0x1   :  { %3139 = sst [smem:[#allocation34_spill]] %s3128_s8 }
   0x2   :  { %3140 = sst [smem:[#allocation35_spill]] %s3129_s9 }
   0x3   :  { %15 = vsyncpa [#allocation7], 0 }
   0x4   :  { %16 = vsyncpa [#allocation10], 0 }
   0x5   :  { %18 = vsyncpa [#allocation10 + $0x1], 0 }
   0x6   :  { %19 = vsyncpa [#allocation13], 0 }
   0x7   :  { %20 = vsyncpa [#allocation8], 0 }
   0x8   :  { %22 = vsyncpa [#allocation8 + $0x1], 0 }
   0x9   :  { %23 = vsyncpa [#allocation17], 0  ;;  %s2489_s30 = smov 0   ;;  %s2491_s10 = smov 0  }
   0xa   :  { %s2493_s11 = smov 0   ;;  %s2495_s12 = smov 0  }
   0xb LB: > { %3141 = sst [smem:[#allocation25_spill]] %s2408_s30  ;;  %s2510_s13 = sadd.s32 4294967295, %s2420_s12   ;;  %s2420_s12 = sphi %s2495_s12, %s3192_s12   ;;  %s2416_s11 = sphi %s2493_s11, %s3191_s11   ;;  %s2412_s10 = sphi %s2491_s10, %s3190_s10   ;;  %s2408_s30 = sphi %s2489_s30, %s3189_s30  }
   0xc   : > { %s1842_s14 = sadd.s32 4294967294, %s2420_s12   ;;  %p70_p0 = scmp.ne.s32.totalorder %s2412_s10, %s2408_s30 }
   0xd   : > { %p3130_p1 = scmp.eq.s32.totalorder %s2510_s13, 0  ;;  %p205_p3 = scmp.eq.s32.totalorder %s1842_s14, 1 }
   0xe   : > { %p1843_p5 = scmp.ge.s32.totalorder %s2420_s12, 1  ;;  %p254_p7 = scmp.lt.s32.totalorder %s2420_s12, 3 }
   0xf   : > { %p2519_p4 = por %p3130_p1, %p70_p0  ;;  %p2524_p6 = por %p205_p3, %p70_p0 }
  0x10   : > { %p2530_p9 = pnand %p1843_p5, %p254_p7  ;;  %s2422_s18 = smov [#allocation11]  }
  0x11   : > { %s3142_s15 = scalar_select %p2519_p4, 1, 0 }
  0x12   : > { %s3143_s16 = scalar_select %p2524_p6, 1, 0 }
  0x13   : > { %s3145_s17 = scalar_select %p2530_p9, 1, 0 }
  0x14   : > { %3144 = sst [smem:[#allocation26_spill]] %s3143_s16  ;;  %s279_s19 = sshll.u32 %s2422_s18, 4  ;;  %s280_s19 = int_to_ptr.vmem [resolvable:$true] %s279_s19 }
  0x15   : > { %p1948_p10 = pneg %p2530_p9  ;;  %s2423_s21 = smov [#allocation12]  }
  0x16   : > { %s292_s22 = sshll.u32 %s2423_s21, 4  ;;  %s2144_s25 = scalar_lea.hbm %s3122_s2, 4096  ;;  %s293_s22 = int_to_ptr.vmem [resolvable:$true] %s292_s22 }
  0x17   : > { %p2539_p12 = pnand %p1948_p10, %p3130_p1  ;;  %p2145_p13 = scmp.ne.s32.totalorder %s3122_s2, %s2144_s25 }
  0x18   : > { %p2151_p7 = scmp.lt.u32.totalorder %s2144_s25, %s3122_s2 }
  0x19   : > { %p2551_p0 = pneg %p2539_p12 }
  0x1b   : > { %p2147_p3 = pnand %p2551_p0, %p2145_p13 }
  0x1d   : > { %p2148_p5 = pneg %p2147_p3 }
  0x1f   : > { %p2153_p10 = pnand %p2151_p7, %p2148_p5 }
  0x21   : > { %2156 = shalt.err (!%p2153_p10)
}
  0x22   : > { %s2157_s18 = scalar_lea.vmem %s280_s19, 4096  ;;  %p2165_p2 = scmp.lt.s32.totalorder %s280_s19, %s280_s19 }
  0x23   : > { %p2158_p11 = scmp.ne.s32.totalorder %s280_s19, %s2157_s18  ;;  %p2166_p6 = scmp.lt.s32.totalorder %s2157_s18, %s2157_s18 }
  0x25   : > { %p2160_p8 = pnand %p2158_p11, %p2551_p0  ;;  %p2167_p4 = por %p2166_p6, %p2165_p2 }
  0x27   : > { %p2161_p1 = pneg %p2160_p8 }
  0x29   : > { %p2168_p9 = pnand %p2167_p4, %p2161_p1 }
  0x2b   : > { %2171 = shalt.err (!%p2168_p9)
}
  0x2c   : > { %s2424_s21 = smov 256   ;;  %s2425_s23 = smov 16  }
  0x2d   : > { %1954 = dma.hbm_to_vmem [thread:$0]  (!%p2539_p12), %s3122_s2, 4096, %s280_s19, [#allocation10], %s2424_s21, %s2424_s21, %s2425_s23  }
  0x2e   : > { %s2426_s26 = smov [#allocation6]   ;;  %s2172_s16 = scalar_lea.hbm %s3123_s3, 8192 }
  0x2f   : > { %s266_s27 = sshll.u32 %s2426_s26, 4  ;;  %p2173_p1 = scmp.ne.s32.totalorder %s3123_s3, %s2172_s16  ;;  %s267_s27 = int_to_ptr.vmem [resolvable:$true] %s266_s27 }
  0x30   : > { %p2179_p6 = scmp.lt.u32.totalorder %s2172_s16, %s3123_s3 }
  0x31   : > { %p2175_p2 = pnand %p2173_p1, %p2551_p0 }
  0x33   : > { %p2176_p4 = pneg %p2175_p2 }
  0x35   : > { %p2181_p8 = pnand %p2179_p6, %p2176_p4 }
  0x37   : > { %2184 = shalt.err (!%p2181_p8)
}
  0x38   : > { %s2185_s19 = scalar_lea.vmem %s293_s22, 8192  ;;  %p2193_p3 = scmp.lt.s32.totalorder %s293_s22, %s293_s22 }
  0x39   : > { %p2186_p9 = scmp.ne.s32.totalorder %s293_s22, %s2185_s19  ;;  %p2194_p5 = scmp.lt.s32.totalorder %s2185_s19, %s2185_s19 }
  0x3b   : > { %p2188_p11 = pnand %p2186_p9, %p2551_p0  ;;  %p2195_p7 = por %p2194_p5, %p2193_p3 }
  0x3d   : > { %p2189_p13 = pneg %p2188_p11 }
  0x3f   : > { %p2196_p10 = pnand %p2195_p7, %p2189_p13 }
  0x41   : > { %2199 = shalt.err (!%p2196_p10)
}
  0x42   : > { %s2427_s30 = smov 512   ;;  %s2428_s21 = smov 32  }
  0x43   : > { %1957 = dma.hbm_to_vmem [thread:$0]  (!%p2539_p12), %s3123_s3, 8192, %s293_s22, [#allocation13], %s2427_s30, %s2427_s30, %s2428_s21  }
  0x44   : > { %s2200_s24 = scalar_lea.hbm %s3120_s0, 8192 }
  0x45   : > { %p2201_p1 = scmp.ne.s32.totalorder %s3120_s0, %s2200_s24  ;;  %p2207_p6 = scmp.lt.u32.totalorder %s2200_s24, %s3120_s0 }
  0x47   : > { %p2203_p2 = pnand %p2201_p1, %p2551_p0 }
  0x49   : > { %p2204_p4 = pneg %p2203_p2 }
  0x4b   : > { %p2209_p8 = pnand %p2207_p6, %p2204_p4 }
  0x4d   : > { %2212 = shalt.err (!%p2209_p8)
}
  0x4e   : > { %s2213_s18 = scalar_lea.vmem %s267_s27, 8192  ;;  %p2221_p3 = scmp.lt.s32.totalorder %s267_s27, %s267_s27 }
  0x4f   : > { %p2214_p9 = scmp.ne.s32.totalorder %s267_s27, %s2213_s18  ;;  %p2222_p5 = scmp.lt.s32.totalorder %s2213_s18, %s2213_s18 }
  0x51   : > { %p2216_p11 = pnand %p2214_p9, %p2551_p0  ;;  %p2223_p7 = por %p2222_p5, %p2221_p3 }
  0x53   : > { %p2217_p13 = pneg %p2216_p11 }
  0x55   : > { %p2224_p10 = pnand %p2223_p7, %p2217_p13 }
  0x57   : > { %2227 = shalt.err (!%p2224_p10)
}
  0x58   : > { %1951 = dma.hbm_to_vmem [thread:$0]  (!%p2539_p12), %s3120_s0, 8192, %s267_s27, [#allocation7], %s2427_s30, %s2427_s30, %s2428_s21  }
  0x59   : > { %s2429_s8 = smov [#allocation14]   ;;  %s2228_s24 = scalar_lea.hbm %s3124_s4, 64 }
  0x5a   : > { %s306_s9 = sshll.u32 %s2429_s8, 4  ;;  %p2229_p1 = scmp.ne.s32.totalorder %s3124_s4, %s2228_s24  ;;  %s307_s9 = int_to_ptr.vmem [resolvable:$true] %s306_s9 }
  0x5b   : > { %p2235_p6 = scmp.lt.u32.totalorder %s2228_s24, %s3124_s4 }
  0x5c   : > { %p2231_p2 = pnand %p2229_p1, %p2551_p0 }
  0x5e   : > { %p2232_p4 = pneg %p2231_p2 }
  0x60   : > { %p2237_p8 = pnand %p2235_p6, %p2232_p4 }
  0x62   : > { %2240 = shalt.err (!%p2237_p8)
}
  0x63   : > { %s2241_s27 = scalar_lea.vmem %s307_s9, 64  ;;  %p2249_p3 = scmp.lt.s32.totalorder %s307_s9, %s307_s9 }
  0x64   : > { %p2242_p9 = scmp.ne.s32.totalorder %s307_s9, %s2241_s27  ;;  %p2250_p5 = scmp.lt.s32.totalorder %s2241_s27, %s2241_s27 }
  0x66   : > { %p2244_p11 = pnand %p2242_p9, %p2551_p0  ;;  %p2251_p7 = por %p2250_p5, %p2249_p3 }
  0x68   : > { %p2245_p13 = pneg %p2244_p11 }
  0x6a   : > { %p2252_p10 = pnand %p2251_p7, %p2245_p13 }
  0x6c   : > { %2255 = shalt.err (!%p2252_p10)
}
  0x6d   : > { %1960 = dma.hbm_to_vmem [thread:$0]  (!%p2539_p12), %s3124_s4, 64, %s307_s9, [#allocation13]  }
  0x6e   : > { %s2622_s28 = sadd.s32 1, %s2420_s12   ;;  %s57_s20 = sadd.s32 1, %s2416_s11 }
  0x6f   : > { %s54_s18 = ssub.s32 %s2420_s12, %s2622_s28  ;;  %p64_p0 = scmp.ne.s32.totalorder %s2416_s11, %s2412_s10 }
  0x70   : > { %p55_p1 = scmp.eq.s32.totalorder %s54_s18, 0  ;;  %p65_p2 = scmp.eq.s32.totalorder %s2420_s12, 0 }
  0x71   : > { %p3148_p4 = scmp.eq.s32.totalorder %s2510_s13, 1  ;;  %p1973_p8 = scmp.lt.s32.totalorder %s2420_s12, 2 }
  0x72   : > { %s2638_s19 = scalar_select %p55_p1, %s2416_s11, %s57_s20  }
  0x73   : > { %p2632_p6 = por %p3148_p4, %p64_p0  ;;  %p66_p9 = por %p65_p2, %p64_p0 }
  0x74   : > { %s323_s8 = sand.u32 1, %s2420_s12   ;;  %s325_s16 = sand.u32 1, %s2416_s11  }
  0x75   : > { %s1849_s9 = sshll.u32 %s325_s16, 4  ;;  %s1918_s23 = sshll.u32 %s2420_s12, 8 }
  0x76   : > { %s2646_s26 = scalar_lea.hbm %s3121_s1, %s1918_s23  ;;  %s327_s29 = scalar_lea.vmem [#allocation9], %s1849_s9 }
  0x77   : > { %s334_s14 = sshll.u32 %s327_s29, 4  ;;  %p2648_p12 = pnand %p1973_p8, %p66_p9  ;;  %s2652_s14 = int_to_ptr.vmem [resolvable:$true] %s334_s14 }
  0x78   : > { %s2654_s30 = scalar_lea.sflag [#allocation10], %s323_s8  ;;  %s2256_s21 = scalar_lea.hbm %s2646_s26, 256 }
  0x79   : > { %p2257_p11 = scmp.ne.s32.totalorder %s2646_s26, %s2256_s21  ;;  %p2258_p13 = pneg %p2648_p12 }
  0x7a   : > { %s2261_s16 = scalar_lea.hbm %s3121_s1, 512  ;;  %p2262_p7 = scmp.lt.u32.totalorder %s2646_s26, %s3121_s1 }
  0x7b   : > { %p2259_p3 = pnand %p2258_p13, %p2257_p11  ;;  %p2263_p10 = scmp.lt.u32.totalorder %s2261_s16, %s2256_s21 }
  0x7c   : > { %p2265_p1 = scmp.lt.u32.totalorder %s2256_s21, %s2646_s26 }
  0x7d   : > { %p2260_p5 = pneg %p2259_p3  ;;  %p2264_p0 = por %p2263_p10, %p2262_p7 }
  0x7f   : > { %p2266_p2 = por %p2265_p1, %p2264_p0 }
  0x81   : > { %p2267_p4 = pnand %p2266_p2, %p2260_p5 }
  0x83   : > { %2270 = shalt.err (!%p2267_p4)
}
  0x84   : > { %s2271_s8 = scalar_lea.vmem %s2652_s14, 256  ;;  %s2430_s24 = smov [#allocation9]  }
  0x85   : > { %p2272_p8 = scmp.ne.s32.totalorder %s2652_s14, %s2271_s8  ;;  %s2276_s25 = sshll.u32 %s2430_s24, 4  ;;  %s2277_s25 = int_to_ptr.vmem [resolvable:$false] %s2276_s25 }
  0x86   : > { %s2278_s29 = scalar_lea.vmem %s2277_s25, 512  ;;  %p2279_p3 = scmp.lt.s32.totalorder %s2652_s14, %s2277_s25 }
  0x87   : > { %p2274_p9 = pnand %p2272_p8, %p2258_p13  ;;  %p2280_p7 = scmp.lt.s32.totalorder %s2278_s29, %s2271_s8 }
  0x89   : > { %p2275_p11 = pneg %p2274_p9  ;;  %p2281_p10 = por %p2280_p7, %p2279_p3 }
  0x8b   : > { %p2282_p0 = pnand %p2281_p10, %p2275_p11 }
  0x8d   : > { %2285 = shalt.err (!%p2282_p0)
}
  0x8e   : > { %s2431_s21 = smov 64   ;;  %s2432_s20 = smov 4  }
  0x8f   : > { %1964 = dma.hbm_to_vmem [thread:$0]  (!%p2648_p12), %s2646_s26, 256, %s2652_s14, %s2654_s30, %s2431_s21, %s2431_s21, %s2432_s20  }
  0x90   : > { %p3151_p13 = scmp.ne.s32.totalorder %s3145_s17, 0 }
  0x92   : > { %346 = sbr.rel (%p3151_p13) target bundleno = 1413 (0x585), region = 48 }
  0x99   : > { %p3152_p5 = scmp.eq.s32.totalorder %s2510_s13, 0 }
  0x9b   : > { %2383 = dma.done.wait (%p3152_p5), [#allocation7], 8192   ;;  %p3153_p1 = pmov %p3152_p5 }
  0x9c   : > { %s352_s18 = sand.u32 1, %s2510_s13   ;;  %s2690_s16 = sand.u32 1, %s2412_s10  }
  0x9d   : > { %2385 = vsyncadd (%p3153_p1), [#allocation7], 4294959104  ;;  %s1854_s9 = sshll.u32 %s2690_s16, 4  ;;  %s353_s23 = scalar_lea.sflag [#allocation10], %s352_s18 }
  0x9e   : > { %s2693_s27 = scalar_lea.vmem [#allocation9], %s1854_s9  ;;  %p3154_p12 = scmp.ne.s32.totalorder %s3142_s15, 0 }
  0xa0   : > { %2387 = dma.done.wait (%p3154_p12), %s353_s23, 256  }
  0xa1   : > { %2389 = vsyncadd (%p3154_p12), %s353_s23, 4294967040  ;;  %p3155_p2 = pmov %p3153_p1 }
  0xa2   : > { %p3156_p4 = pmov %p3153_p1 }
  0xa3   : > { %2391 = dma.done.wait (%p3155_p2), [#allocation10], 4096  }
  0xa4   : > { %2393 = vsyncadd (%p3156_p4), [#allocation10], 4294963200  ;;  %p3157_p8 = pmov %p3153_p1 }
  0xa5   : > { %p3158_p9 = pmov %p3153_p1 }
  0xa6   : > { %2395 = dma.done.wait (%p3157_p8), [#allocation13], 8256  }
  0xa7   : > { %2397 = vsyncadd (%p3158_p9), [#allocation13], 4294959040  ;;  %s1858_s17 = sshll.u32 %s2690_s16, 5  ;;  %p3159_p11 = scmp.ne.s32.totalorder %s2510_s13, 0 }
  0xa8   : > { %s2708_s26 = scalar_lea.vmem [#allocation15], %s1858_s17  ;;  %v410_v0 = vld [vmem:[#allocation6] sm:$0xff] (!%p3159_p11)  ;;  %v411_v5 = vld [vmem:[#allocation6 + $0x8] sm:$0xff] (!%p3159_p11)  ;;  %v412_v10 = vld [vmem:[#allocation6 + $0x10] sm:$0xff] (!%p3159_p11) }
  0xa9   : > { %409 = sbr.rel (%p3159_p11) target bundleno = 233 (0xe9), region = 72  ;;  %v414_v1 = vld [vmem:[#allocation6 + $0x20] sm:$0xff] (!%p3159_p11)  ;;  %vm474_vm0 = vcmp.ge.f32.partialorder (!%p3159_p11), %v410_v0, 0.5  ;;  %v415_v6 = vld [vmem:[#allocation6 + $0x28] sm:$0xff] (!%p3159_p11)  ;;  %vm475_vm2 = vcmp.ge.f32.partialorder (!%p3159_p11), %v411_v5, 0.5  ;;  %v416_v14 = vld [vmem:[#allocation6 + $0x30] sm:$0xff] (!%p3159_p11) }
  0xaa   : > { %v538_v2 = vld [vmem:[#allocation12] sm:$0xff] (!%p3159_p11)  ;;  %vm478_vm1 = vcmp.ge.f32.partialorder (!%p3159_p11), %v414_v1, 0.5  ;;  %vm479_vm3 = vcmp.ge.f32.partialorder (!%p3159_p11), %v415_v6, 0.5  ;;  %v539_v8 = vld [vmem:[#allocation12 + $0x8] sm:$0xff] (!%p3159_p11)  ;;  %vm476_vm4 = vcmp.ge.f32.partialorder (!%p3159_p11), %v412_v10, 0.5  ;;  %v540_v15 = vld [vmem:[#allocation12 + $0x10] sm:$0xff] (!%p3159_p11) }
  0xab   : > { %v542_v3 = vld [vmem:[#allocation12 + $0x20] sm:$0xff] (!%p3159_p11)  ;;  %v602_v4 = vmul.f32 (!%p3159_p11), 2.0, %v538_v2  ;;  %v543_v9 = vld [vmem:[#allocation12 + $0x28] sm:$0xff] (!%p3159_p11)  ;;  %v603_v12 = vmul.f32 (!%p3159_p11), 2.0, %v539_v8  ;;  %vm480_vm5 = vcmp.ge.f32.partialorder (!%p3159_p11), %v416_v14, 0.5  ;;  %v544_v17 = vld [vmem:[#allocation12 + $0x30] sm:$0xff] (!%p3159_p11) }
  0xac   : > { %v606_v7 = vmul.f32 (!%p3159_p11), 2.0, %v542_v3  ;;  %v607_v13 = vmul.f32 (!%p3159_p11), 2.0, %v543_v9  ;;  %v604_v18 = vmul.f32 (!%p3159_p11), 2.0, %v540_v15  ;;  %v413_v19 = vld [vmem:[#allocation6 + $0x18] sm:$0xff] (!%p3159_p11)  ;;  %v608_v24 = vmul.f32 (!%p3159_p11), 2.0, %v544_v17  ;;  %v418_v27 = vld [vmem:[#allocation6 + $0x40] sm:$0xff] (!%p3159_p11) }
  0xad   : > { %v666_v11 = vsel (!%p3159_p11), %vm474_vm0, %v602_v4, 0.0  ;;  %v417_v20 = vld [vmem:[#allocation6 + $0x38] sm:$0xff] (!%p3159_p11)  ;;  %v667_v22 = vsel (!%p3159_p11), %vm475_vm2, %v603_v12, 0.0  ;;  %vm477_vm6 = vcmp.ge.f32.partialorder (!%p3159_p11), %v413_v19, 0.5  ;;  %v422_v30 = vld [vmem:[#allocation6 + $0x60] sm:$0xff] (!%p3159_p11)  ;;  %vm482_vm8 = vcmp.ge.f32.partialorder (!%p3159_p11), %v418_v27, 0.5 }
  0xae   : > { %v670_v16 = vsel (!%p3159_p11), %vm478_vm1, %v606_v7, 0.0  ;;  %v671_v23 = vsel (!%p3159_p11), %vm479_vm3, %v607_v13, 0.0  ;;  %v541_v25 = vld [vmem:[#allocation12 + $0x18] sm:$0xff] (!%p3159_p11)  ;;  %v668_v29 = vsel (!%p3159_p11), %vm476_vm4, %v604_v18, 0.0  ;;  %vm481_vm7 = vcmp.ge.f32.partialorder (!%p3159_p11), %v417_v20, 0.5  ;;  %v546_v31 = vld [vmem:[#allocation12 + $0x40] sm:$0xff] (!%p3159_p11) }
  0xaf   : > { %v730_v21 = vpack.c.bf16 (!%p3159_p11), %v670_v16, %v666_v11  ;;  %v545_v26 = vld [vmem:[#allocation12 + $0x38] sm:$0xff] (!%p3159_p11)  ;;  %v731_v28 = vpack.c.bf16 (!%p3159_p11), %v671_v23, %v667_v22  ;;  %v550_v32 = vld [vmem:[#allocation12 + $0x60] sm:$0xff] (!%p3159_p11)  ;;  %v672_v33 = vsel (!%p3159_p11), %vm480_vm5, %v608_v24, 0.0  ;;  %v605_v34 = vmul.f32 (!%p3159_p11), 2.0, %v541_v25  ;;  %v419_v36 = vld [vmem:[#allocation6 + $0x48] sm:$0xff] (!%p3159_p11) }
  0xb0   : > { %v609_v35 = vmul.f32 2.0, %v545_v26  ;;  %v423_v37 = vld [vmem:[#allocation6 + $0x68] sm:$0xff]  ;;  %v732_v38 = vpack.c.bf16 %v672_v33, %v668_v29  ;;  %vm486_vm9 = vcmp.ge.f32.partialorder %v422_v30, 0.5  ;;  %v610_v39 = vmul.f32 2.0, %v546_v31  ;;  %v420_v43 = vld [vmem:[#allocation6 + $0x50] sm:$0xff]  ;;  %v421_v53 = vld [vmem:[#allocation6 + $0x58] sm:$0xff] }
  0xb1   : > { %762 = vst [vmem:[#allocation2] sm:$0xff] %v730_v21  ;;  %763 = vst [vmem:[#allocation2 + $0x8] sm:$0xff] %v731_v28  ;;  %v614_v40 = vmul.f32 2.0, %v550_v32  ;;  %v547_v41 = vld [vmem:[#allocation12 + $0x48] sm:$0xff]  ;;  %v669_v44 = vsel %vm477_vm6, %v605_v34, 0.0  ;;  %vm483_vm10 = vcmp.ge.f32.partialorder %v419_v36, 0.5 }
  0xb2   : > { %v551_v42 = vld [vmem:[#allocation12 + $0x68] sm:$0xff]  ;;  %v673_v45 = vsel %vm481_vm7, %v609_v35, 0.0  ;;  %vm487_vm11 = vcmp.ge.f32.partialorder %v423_v37, 0.5  ;;  %v424_v46 = vld [vmem:[#allocation6 + $0x70] sm:$0xff]  ;;  %764 = vst [vmem:[#allocation2 + $0x10] sm:$0xff] %v732_v38  ;;  %v674_v49 = vsel %vm482_vm8, %v610_v39, 0.0 }
  0xb3   : > { %v548_v47 = vld [vmem:[#allocation12 + $0x50] sm:$0xff]  ;;  %v733_v48 = vpack.c.bf16 %v673_v45, %v669_v44  ;;  %v678_v50 = vsel %vm486_vm9, %v614_v40, 0.0  ;;  %v611_v51 = vmul.f32 2.0, %v547_v41  ;;  %v425_v54 = vld [vmem:[#allocation6 + $0x78] sm:$0xff]  ;;  %v615_v56 = vmul.f32 2.0, %v551_v42  ;;  %v426_v59 = vld [vmem:[#allocation6 + $0x80] sm:$0xff] }
  0xb4   : > { %v552_v52 = vld [vmem:[#allocation12 + $0x70] sm:$0xff]  ;;  %v734_v55 = vpack.c.bf16 %v678_v50, %v674_v49  ;;  %vm484_vm12 = vcmp.ge.f32.partialorder %v420_v43, 0.5  ;;  %vm488_vm13 = vcmp.ge.f32.partialorder %v424_v46, 0.5  ;;  %v549_v57 = vld [vmem:[#allocation12 + $0x58] sm:$0xff]  ;;  %v612_v61 = vmul.f32 2.0, %v548_v47  ;;  %v430_v63 = vld [vmem:[#allocation6 + $0xa0] sm:$0xff] }
  0xb5   : > { %v553_v58 = vld [vmem:[#allocation12 + $0x78] sm:$0xff]  ;;  %765 = vst [vmem:[#allocation2 + $0x18] sm:$0xff] %v733_v48  ;;  %v675_v60 = vsel %vm483_vm10, %v611_v51, 0.0  ;;  %v616_v62 = vmul.f32 2.0, %v552_v52  ;;  %vm485_vm14 = vcmp.ge.f32.partialorder %v421_v53, 0.5  ;;  %v554_v0 = vld [vmem:[#allocation12 + $0x80] sm:$0xff] }
  0xb6   : > { %766 = vst [vmem:[#allocation2 + $0x20] sm:$0xff] %v734_v55  ;;  %v679_v1 = vsel %vm487_vm11, %v615_v56, 0.0  ;;  %vm489_vm15 = vcmp.ge.f32.partialorder %v425_v54, 0.5  ;;  %v613_v2 = vmul.f32 2.0, %v549_v57  ;;  %v617_v3 = vmul.f32 2.0, %v553_v58  ;;  %v558_v4 = vld [vmem:[#allocation12 + $0xa0] sm:$0xff] }
  0xb7   : > { %v427_v5 = vld [vmem:[#allocation6 + $0x88] sm:$0xff]  ;;  %v735_v6 = vpack.c.bf16 %v679_v1, %v675_v60  ;;  %v676_v7 = vsel %vm484_vm12, %v612_v61, 0.0  ;;  %v680_v8 = vsel %vm488_vm13, %v616_v62, 0.0  ;;  %vm490_vm0 = vcmp.ge.f32.partialorder %v426_v59, 0.5  ;;  %v428_v15 = vld [vmem:[#allocation6 + $0x90] sm:$0xff]  ;;  %v429_v22 = vld [vmem:[#allocation6 + $0x98] sm:$0xff] }
  0xb8   : > { %v431_v9 = vld [vmem:[#allocation6 + $0xa8] sm:$0xff]  ;;  %v736_v12 = vpack.c.bf16 %v680_v8, %v676_v7  ;;  %v677_v13 = vsel %vm485_vm14, %v613_v2, 0.0  ;;  %v681_v14 = vsel %vm489_vm15, %v617_v3, 0.0  ;;  %vm494_vm1 = vcmp.ge.f32.partialorder %v430_v63, 0.5  ;;  %v432_v16 = vld [vmem:[#allocation6 + $0xb0] sm:$0xff]  ;;  %v433_v25 = vld [vmem:[#allocation6 + $0xb8] sm:$0xff] }
  0xb9   : > { %v555_v10 = vld [vmem:[#allocation12 + $0x88] sm:$0xff]  ;;  %v556_v17 = vld [vmem:[#allocation12 + $0x90] sm:$0xff]  ;;  %767 = vst [vmem:[#allocation2 + $0x28] sm:$0xff] %v735_v6  ;;  %v737_v18 = vpack.c.bf16 %v681_v14, %v677_v13  ;;  %v618_v19 = vmul.f32 2.0, %v554_v0  ;;  %v622_v20 = vmul.f32 2.0, %v558_v4  ;;  %vm491_vm2 = vcmp.ge.f32.partialorder %v427_v5, 0.5 }
  0xba   : > { %v559_v11 = vld [vmem:[#allocation12 + $0xa8] sm:$0xff]  ;;  %v560_v21 = vld [vmem:[#allocation12 + $0xb0] sm:$0xff]  ;;  %768 = vst [vmem:[#allocation2 + $0x30] sm:$0xff] %v736_v12  ;;  %vm495_vm3 = vcmp.ge.f32.partialorder %v431_v9, 0.5  ;;  %v619_v23 = vmul.f32 2.0, %v555_v10  ;;  %vm492_vm4 = vcmp.ge.f32.partialorder %v428_v15, 0.5 }
  0xbb   : > { %v623_v24 = vmul.f32 2.0, %v559_v11  ;;  %v557_v26 = vld [vmem:[#allocation12 + $0x98] sm:$0xff]  ;;  %769 = vst [vmem:[#allocation2 + $0x38] sm:$0xff] %v737_v18  ;;  %v682_v27 = vsel %vm490_vm0, %v618_v19, 0.0  ;;  %v686_v28 = vsel %vm494_vm1, %v622_v20, 0.0  ;;  %vm496_vm5 = vcmp.ge.f32.partialorder %v432_v16, 0.5 }
  0xbc   : > { %v620_v29 = vmul.f32 2.0, %v556_v17  ;;  %v561_v30 = vld [vmem:[#allocation12 + $0xb8] sm:$0xff]  ;;  %v434_v31 = vld [vmem:[#allocation6 + $0xc0] sm:$0xff]  ;;  %v738_v32 = vpack.c.bf16 %v686_v28, %v682_v27  ;;  %v683_v33 = vsel %vm491_vm2, %v619_v23, 0.0  ;;  %v624_v35 = vmul.f32 2.0, %v560_v21  ;;  %v435_v41 = vld [vmem:[#allocation6 + $0xc8] sm:$0xff] }
  0xbd   : > { %v687_v34 = vsel %vm495_vm3, %v623_v24, 0.0  ;;  %v438_v36 = vld [vmem:[#allocation6 + $0xe0] sm:$0xff]  ;;  %vm493_vm6 = vcmp.ge.f32.partialorder %v429_v22, 0.5  ;;  %vm497_vm7 = vcmp.ge.f32.partialorder %v433_v25, 0.5  ;;  %v439_v42 = vld [vmem:[#allocation6 + $0xe8] sm:$0xff]  ;;  %v621_v44 = vmul.f32 2.0, %v557_v26 }
  0xbe   : > { %v562_v37 = vld [vmem:[#allocation12 + $0xc0] sm:$0xff]  ;;  %v739_v39 = vpack.c.bf16 %v687_v34, %v683_v33  ;;  %v684_v40 = vsel %vm492_vm4, %v620_v29, 0.0  ;;  %770 = vst [vmem:[#allocation2 + $0x40] sm:$0xff] %v738_v32  ;;  %v688_v43 = vsel %vm496_vm5, %v624_v35, 0.0  ;;  %v625_v45 = vmul.f32 2.0, %v561_v30  ;;  %v563_v46 = vld [vmem:[#allocation12 + $0xc8] sm:$0xff] }
  0xbf   : > { %v566_v38 = vld [vmem:[#allocation12 + $0xe0] sm:$0xff]  ;;  %vm498_vm8 = vcmp.ge.f32.partialorder %v434_v31, 0.5  ;;  %v567_v47 = vld [vmem:[#allocation12 + $0xe8] sm:$0xff]  ;;  %v740_v48 = vpack.c.bf16 %v688_v43, %v684_v40  ;;  %vm502_vm9 = vcmp.ge.f32.partialorder %v438_v36, 0.5  ;;  %v626_v49 = vmul.f32 2.0, %v562_v37  ;;  %v436_v51 = vld [vmem:[#allocation6 + $0xd0] sm:$0xff] }
  0xc0   : > { %771 = vst [vmem:[#allocation2 + $0x48] sm:$0xff] %v739_v39  ;;  %v630_v50 = vmul.f32 2.0, %v566_v38  ;;  %v440_v52 = vld [vmem:[#allocation6 + $0xf0] sm:$0xff]  ;;  %v685_v54 = vsel %vm493_vm6, %v621_v44, 0.0  ;;  %v689_v55 = vsel %vm497_vm7, %v625_v45, 0.0  ;;  %vm499_vm10 = vcmp.ge.f32.partialorder %v435_v41, 0.5 }
  0xc1   : > { %v564_v53 = vld [vmem:[#allocation12 + $0xd0] sm:$0xff]  ;;  %vm503_vm11 = vcmp.ge.f32.partialorder %v439_v42, 0.5  ;;  %v437_v57 = vld [vmem:[#allocation6 + $0xd8] sm:$0xff]  ;;  %772 = vst [vmem:[#allocation2 + $0x50] sm:$0xff] %v740_v48  ;;  %v741_v58 = vpack.c.bf16 %v689_v55, %v685_v54  ;;  %v690_v59 = vsel %vm498_vm8, %v626_v49, 0.0  ;;  %v627_v61 = vmul.f32 2.0, %v563_v46 }
  0xc2   : > { %v568_v56 = vld [vmem:[#allocation12 + $0xf0] sm:$0xff]  ;;  %v694_v60 = vsel %vm502_vm9, %v630_v50, 0.0  ;;  %v441_v62 = vld [vmem:[#allocation6 + $0xf8] sm:$0xff]  ;;  %v631_v2 = vmul.f32 2.0, %v567_v47  ;;  %vm500_vm12 = vcmp.ge.f32.partialorder %v436_v51, 0.5  ;;  %vm504_vm13 = vcmp.ge.f32.partialorder %v440_v52, 0.5 }
  0xc3   : > { %v565_v63 = vld [vmem:[#allocation12 + $0xd8] sm:$0xff]  ;;  %v742_v1 = vpack.c.bf16 %v694_v60, %v690_v59  ;;  %v442_v3 = vld [vmem:[#allocation6 + $0x100] sm:$0xff]  ;;  %773 = vst [vmem:[#allocation2 + $0x58] sm:$0xff] %v741_v58  ;;  %v691_v5 = vsel %vm499_vm10, %v627_v61, 0.0  ;;  %v628_v6 = vmul.f32 2.0, %v564_v53  ;;  %v632_v7 = vmul.f32 2.0, %v568_v56 }
  0xc4   : > { %v569_v0 = vld [vmem:[#allocation12 + $0xf8] sm:$0xff]  ;;  %v446_v4 = vld [vmem:[#allocation6 + $0x120] sm:$0xff]  ;;  %vm501_vm14 = vcmp.ge.f32.partialorder %v437_v57, 0.5  ;;  %v695_v10 = vsel %vm503_vm11, %v631_v2, 0.0  ;;  %vm505_vm15 = vcmp.ge.f32.partialorder %v441_v62, 0.5  ;;  %v629_v11 = vmul.f32 2.0, %v565_v63 }
  0xc5   : > { %v570_v8 = vld [vmem:[#allocation12 + $0x100] sm:$0xff]  ;;  %774 = vst [vmem:[#allocation2 + $0x60] sm:$0xff] %v742_v1  ;;  %v633_v12 = vmul.f32 2.0, %v569_v0  ;;  %v443_v13 = vld [vmem:[#allocation6 + $0x108] sm:$0xff]  ;;  %v743_v15 = vpack.c.bf16 %v695_v10, %v691_v5  ;;  %v692_v16 = vsel %vm500_vm12, %v628_v6, 0.0  ;;  %v696_v17 = vsel %vm504_vm13, %v632_v7, 0.0 }
  0xc6   : > { %v574_v9 = vld [vmem:[#allocation12 + $0x120] sm:$0xff]  ;;  %v447_v14 = vld [vmem:[#allocation6 + $0x128] sm:$0xff]  ;;  %vm506_vm0 = vcmp.ge.f32.partialorder %v442_v3, 0.5  ;;  %v444_v20 = vld [vmem:[#allocation6 + $0x110] sm:$0xff]  ;;  %v744_v21 = vpack.c.bf16 %v696_v17, %v692_v16  ;;  %v693_v22 = vsel %vm501_vm14, %v629_v11, 0.0  ;;  %vm510_vm1 = vcmp.ge.f32.partialorder %v446_v4, 0.5 }
  0xc7   : > { %v571_v18 = vld [vmem:[#allocation12 + $0x108] sm:$0xff]  ;;  %v697_v23 = vsel %vm505_vm15, %v633_v12, 0.0  ;;  %v448_v24 = vld [vmem:[#allocation6 + $0x130] sm:$0xff]  ;;  %775 = vst [vmem:[#allocation2 + $0x68] sm:$0xff] %v743_v15  ;;  %v634_v27 = vmul.f32 2.0, %v570_v8  ;;  %v638_v28 = vmul.f32 2.0, %v574_v9 }
  0xc8   : > { %v575_v19 = vld [vmem:[#allocation12 + $0x128] sm:$0xff]  ;;  %v572_v25 = vld [vmem:[#allocation12 + $0x110] sm:$0xff]  ;;  %v745_v26 = vpack.c.bf16 %v697_v23, %v693_v22  ;;  %vm507_vm2 = vcmp.ge.f32.partialorder %v443_v13, 0.5  ;;  %v445_v30 = vld [vmem:[#allocation6 + $0x118] sm:$0xff]  ;;  %776 = vst [vmem:[#allocation2 + $0x70] sm:$0xff] %v744_v21  ;;  %vm511_vm3 = vcmp.ge.f32.partialorder %v447_v14, 0.5 }
  0xc9   : > { %v576_v29 = vld [vmem:[#allocation12 + $0x130] sm:$0xff]  ;;  %v635_v31 = vmul.f32 2.0, %v571_v18  ;;  %v639_v32 = vmul.f32 2.0, %v575_v19  ;;  %vm508_vm4 = vcmp.ge.f32.partialorder %v444_v20, 0.5  ;;  %v449_v33 = vld [vmem:[#allocation6 + $0x138] sm:$0xff]  ;;  %v698_v35 = vsel %vm506_vm0, %v634_v27, 0.0 }
  0xca   : > { %v573_v34 = vld [vmem:[#allocation12 + $0x118] sm:$0xff]  ;;  %777 = vst [vmem:[#allocation2 + $0x78] sm:$0xff] %v745_v26  ;;  %v702_v36 = vsel %vm510_vm1, %v638_v28, 0.0  ;;  %vm512_vm5 = vcmp.ge.f32.partialorder %v448_v24, 0.5  ;;  %v636_v37 = vmul.f32 2.0, %v572_v25  ;;  %v450_v39 = vld [vmem:[#allocation6 + $0x140] sm:$0xff] }
  0xcb   : > { %v577_v38 = vld [vmem:[#allocation12 + $0x138] sm:$0xff]  ;;  %v746_v40 = vpack.c.bf16 %v702_v36, %v698_v35  ;;  %v699_v41 = vsel %vm507_vm2, %v635_v31, 0.0  ;;  %v703_v42 = vsel %vm511_vm3, %v639_v32, 0.0  ;;  %v640_v43 = vmul.f32 2.0, %v576_v29  ;;  %v454_v44 = vld [vmem:[#allocation6 + $0x160] sm:$0xff]  ;;  %v451_v49 = vld [vmem:[#allocation6 + $0x148] sm:$0xff] }
  0xcc   : > { %v578_v45 = vld [vmem:[#allocation12 + $0x140] sm:$0xff]  ;;  %v747_v47 = vpack.c.bf16 %v703_v42, %v699_v41  ;;  %v700_v48 = vsel %vm508_vm4, %v636_v37, 0.0  ;;  %vm509_vm6 = vcmp.ge.f32.partialorder %v445_v30, 0.5  ;;  %vm513_vm7 = vcmp.ge.f32.partialorder %v449_v33, 0.5  ;;  %v455_v50 = vld [vmem:[#allocation6 + $0x168] sm:$0xff]  ;;  %v452_v59 = vld [vmem:[#allocation6 + $0x150] sm:$0xff] }
  0xcd   : > { %v582_v46 = vld [vmem:[#allocation12 + $0x160] sm:$0xff]  ;;  %778 = vst [vmem:[#allocation2 + $0x80] sm:$0xff] %v746_v40  ;;  %v704_v51 = vsel %vm512_vm5, %v640_v43, 0.0  ;;  %v637_v52 = vmul.f32 2.0, %v573_v34  ;;  %v641_v53 = vmul.f32 2.0, %v577_v38  ;;  %vm514_vm8 = vcmp.ge.f32.partialorder %v450_v39, 0.5 }
  0xce   : > { %v579_v54 = vld [vmem:[#allocation12 + $0x148] sm:$0xff]  ;;  %779 = vst [vmem:[#allocation2 + $0x88] sm:$0xff] %v747_v47  ;;  %v748_v56 = vpack.c.bf16 %v704_v51, %v700_v48  ;;  %vm518_vm9 = vcmp.ge.f32.partialorder %v454_v44, 0.5  ;;  %v642_v57 = vmul.f32 2.0, %v578_v45  ;;  %v646_v58 = vmul.f32 2.0, %v582_v46  ;;  %v456_v60 = vld [vmem:[#allocation6 + $0x170] sm:$0xff] }
  0xcf   : > { %v583_v55 = vld [vmem:[#allocation12 + $0x168] sm:$0xff]  ;;  %v580_v61 = vld [vmem:[#allocation12 + $0x150] sm:$0xff]  ;;  %v701_v62 = vsel %vm509_vm6, %v637_v52, 0.0  ;;  %v705_v63 = vsel %vm513_vm7, %v641_v53, 0.0  ;;  %vm515_vm10 = vcmp.ge.f32.partialorder %v451_v49, 0.5  ;;  %vm519_vm11 = vcmp.ge.f32.partialorder %v455_v50, 0.5 }
  0xd0   : > { %v584_v0 = vld [vmem:[#allocation12 + $0x170] sm:$0xff]  ;;  %v453_v1 = vld [vmem:[#allocation6 + $0x158] sm:$0xff]  ;;  %780 = vst [vmem:[#allocation2 + $0x90] sm:$0xff] %v748_v56  ;;  %v749_v2 = vpack.c.bf16 %v705_v63, %v701_v62  ;;  %v706_v3 = vsel %vm514_vm8, %v642_v57, 0.0  ;;  %v710_v4 = vsel %vm518_vm9, %v646_v58, 0.0  ;;  %v643_v5 = vmul.f32 2.0, %v579_v54 }
  0xd1   : > { %v457_v6 = vld [vmem:[#allocation6 + $0x178] sm:$0xff]  ;;  %v750_v9 = vpack.c.bf16 %v710_v4, %v706_v3  ;;  %v647_v10 = vmul.f32 2.0, %v583_v55  ;;  %vm516_vm12 = vcmp.ge.f32.partialorder %v452_v59, 0.5  ;;  %vm520_vm13 = vcmp.ge.f32.partialorder %v456_v60, 0.5  ;;  %v458_v11 = vld [vmem:[#allocation6 + $0x180] sm:$0xff]  ;;  %v459_v21 = vld [vmem:[#allocation6 + $0x188] sm:$0xff] }
  0xd2   : > { %v581_v7 = vld [vmem:[#allocation12 + $0x158] sm:$0xff]  ;;  %v462_v12 = vld [vmem:[#allocation6 + $0x1a0] sm:$0xff]  ;;  %781 = vst [vmem:[#allocation2 + $0x98] sm:$0xff] %v749_v2  ;;  %v707_v13 = vsel %vm515_vm10, %v643_v5, 0.0  ;;  %v644_v14 = vmul.f32 2.0, %v580_v61  ;;  %v648_v15 = vmul.f32 2.0, %v584_v0 }
  0xd3   : > { %v585_v8 = vld [vmem:[#allocation12 + $0x178] sm:$0xff]  ;;  %vm517_vm14 = vcmp.ge.f32.partialorder %v453_v1, 0.5  ;;  %v586_v16 = vld [vmem:[#allocation12 + $0x180] sm:$0xff]  ;;  %782 = vst [vmem:[#allocation2 + $0xa0] sm:$0xff] %v750_v9  ;;  %v711_v18 = vsel %vm519_vm11, %v647_v10, 0.0  ;;  %vm521_vm15 = vcmp.ge.f32.partialorder %v457_v6, 0.5 }
  0xd4   : > { %v590_v17 = vld [vmem:[#allocation12 + $0x1a0] sm:$0xff]  ;;  %v645_v19 = vmul.f32 2.0, %v581_v7  ;;  %v649_v20 = vmul.f32 2.0, %v585_v8  ;;  %v463_v22 = vld [vmem:[#allocation6 + $0x1a8] sm:$0xff]  ;;  %v751_v23 = vpack.c.bf16 %v711_v18, %v707_v13  ;;  %v708_v24 = vsel %vm516_vm12, %v644_v14, 0.0  ;;  %v460_v28 = vld [vmem:[#allocation6 + $0x190] sm:$0xff] }
  0xd5   : > { %v712_v25 = vsel %vm520_vm13, %v648_v15, 0.0  ;;  %vm522_vm0 = vcmp.ge.f32.partialorder %v458_v11, 0.5  ;;  %v587_v26 = vld [vmem:[#allocation12 + $0x188] sm:$0xff]  ;;  %vm526_vm1 = vcmp.ge.f32.partialorder %v462_v12, 0.5  ;;  %v464_v32 = vld [vmem:[#allocation6 + $0x1b0] sm:$0xff]  ;;  %v650_v35 = vmul.f32 2.0, %v586_v16 }
  0xd6   : > { %v591_v27 = vld [vmem:[#allocation12 + $0x1a8] sm:$0xff]  ;;  %v752_v29 = vpack.c.bf16 %v712_v25, %v708_v24  ;;  %v709_v30 = vsel %vm517_vm14, %v645_v19, 0.0  ;;  %v713_v31 = vsel %vm521_vm15, %v649_v20, 0.0  ;;  %v588_v33 = vld [vmem:[#allocation12 + $0x190] sm:$0xff]  ;;  %783 = vst [vmem:[#allocation2 + $0xa8] sm:$0xff] %v751_v23  ;;  %v654_v36 = vmul.f32 2.0, %v590_v17 }
  0xd7   : > { %v753_v34 = vpack.c.bf16 %v713_v31, %v709_v30  ;;  %vm523_vm2 = vcmp.ge.f32.partialorder %v459_v21, 0.5  ;;  %v592_v37 = vld [vmem:[#allocation12 + $0x1b0] sm:$0xff]  ;;  %v461_v38 = vld [vmem:[#allocation6 + $0x198] sm:$0xff]  ;;  %vm527_vm3 = vcmp.ge.f32.partialorder %v463_v22, 0.5  ;;  %v651_v40 = vmul.f32 2.0, %v587_v26  ;;  %v466_v47 = vld [vmem:[#allocation6 + $0x1c0] sm:$0xff] }
  0xd8   : > { %v465_v39 = vld [vmem:[#allocation6 + $0x1b8] sm:$0xff]  ;;  %784 = vst [vmem:[#allocation2 + $0xb0] sm:$0xff] %v752_v29  ;;  %v655_v41 = vmul.f32 2.0, %v591_v27  ;;  %vm524_vm4 = vcmp.ge.f32.partialorder %v460_v28, 0.5  ;;  %v714_v44 = vsel %vm522_vm0, %v650_v35, 0.0  ;;  %v718_v45 = vsel %vm526_vm1, %v654_v36, 0.0 }
  0xd9   : > { %v589_v42 = vld [vmem:[#allocation12 + $0x198] sm:$0xff]  ;;  %785 = vst [vmem:[#allocation2 + $0xb8] sm:$0xff] %v753_v34  ;;  %vm528_vm5 = vcmp.ge.f32.partialorder %v464_v32, 0.5  ;;  %v652_v46 = vmul.f32 2.0, %v588_v33  ;;  %v470_v48 = vld [vmem:[#allocation6 + $0x1e0] sm:$0xff]  ;;  %v754_v49 = vpack.c.bf16 %v718_v45, %v714_v44  ;;  %v715_v50 = vsel %vm523_vm2, %v651_v40, 0.0 }
  0xda   : > { %v593_v43 = vld [vmem:[#allocation12 + $0x1b8] sm:$0xff]  ;;  %v719_v51 = vsel %vm527_vm3, %v655_v41, 0.0  ;;  %v656_v52 = vmul.f32 2.0, %v592_v37  ;;  %v594_v53 = vld [vmem:[#allocation12 + $0x1c0] sm:$0xff]  ;;  %v467_v55 = vld [vmem:[#allocation6 + $0x1c8] sm:$0xff]  ;;  %vm525_vm6 = vcmp.ge.f32.partialorder %v461_v38, 0.5 }
  0xdb   : > { %v598_v54 = vld [vmem:[#allocation12 + $0x1e0] sm:$0xff]  ;;  %v755_v56 = vpack.c.bf16 %v719_v51, %v715_v50  ;;  %v716_v57 = vsel %vm524_vm4, %v652_v46, 0.0  ;;  %vm529_vm7 = vcmp.ge.f32.partialorder %v465_v39, 0.5  ;;  %v471_v58 = vld [vmem:[#allocation6 + $0x1e8] sm:$0xff]  ;;  %786 = vst [vmem:[#allocation2 + $0xc0] sm:$0xff] %v754_v49  ;;  %v653_v62 = vmul.f32 2.0, %v589_v42 }
  0xdc   : > { %v595_v59 = vld [vmem:[#allocation12 + $0x1c8] sm:$0xff]  ;;  %v720_v61 = vsel %vm528_vm5, %v656_v52, 0.0  ;;  %v657_v63 = vmul.f32 2.0, %v593_v43  ;;  %vm530_vm8 = vcmp.ge.f32.partialorder %v466_v47, 0.5  ;;  %v794_v0 = vld [vmem:[%s3125_s5] sm:$0xff]  ;;  %vm534_vm9 = vcmp.ge.f32.partialorder %v470_v48, 0.5 }
  0xdd   : > { %v599_v60 = vld [vmem:[#allocation12 + $0x1e8] sm:$0xff]  ;;  %v796_v1 = vld [vmem:[%s3126_s6] sm:$0xff]  ;;  %787 = vst [vmem:[#allocation2 + $0xc8] sm:$0xff] %v755_v56  ;;  %v756_v2 = vpack.c.bf16 %v720_v61, %v716_v57  ;;  %v658_v3 = vmul.f32 2.0, %v594_v53  ;;  %v662_v4 = vmul.f32 2.0, %v598_v54  ;;  %795 = vst [vmem:[#allocation4] sm:$0xff] %v794_v0 }
  0xde   : > { %v468_v5 = vld [vmem:[#allocation6 + $0x1d0] sm:$0xff]  ;;  %797 = vst [vmem:[#allocation5] sm:$0xff] %v796_v1  ;;  %v717_v8 = vsel %vm525_vm6, %v653_v62, 0.0  ;;  %v721_v9 = vsel %vm529_vm7, %v657_v63, 0.0  ;;  %vm531_vm10 = vcmp.ge.f32.partialorder %v467_v55, 0.5  ;;  %vm535_vm11 = vcmp.ge.f32.partialorder %v471_v58, 0.5 }
  0xdf   : > { %v472_v6 = vld [vmem:[#allocation6 + $0x1f0] sm:$0xff]  ;;  %v469_v11 = vld [vmem:[#allocation6 + $0x1d8] sm:$0xff]  ;;  %788 = vst [vmem:[#allocation2 + $0xd0] sm:$0xff] %v756_v2  ;;  %v757_v12 = vpack.c.bf16 %v721_v9, %v717_v8  ;;  %v722_v13 = vsel %vm530_vm8, %v658_v3, 0.0  ;;  %v726_v14 = vsel %vm534_vm9, %v662_v4, 0.0  ;;  %v659_v15 = vmul.f32 2.0, %v595_v59 }
  0xe0   : > { %v596_v7 = vld [vmem:[#allocation12 + $0x1d0] sm:$0xff]  ;;  %v473_v16 = vld [vmem:[#allocation6 + $0x1f8] sm:$0xff]  ;;  %v758_v19 = vpack.c.bf16 %v726_v14, %v722_v13  ;;  %v663_v20 = vmul.f32 2.0, %v599_v60  ;;  %vm532_vm12 = vcmp.ge.f32.partialorder %v468_v5, 0.5  ;;  %vm536_vm13 = vcmp.ge.f32.partialorder %v472_v6, 0.5 }
  0xe1   : > { %v600_v10 = vld [vmem:[#allocation12 + $0x1f0] sm:$0xff]  ;;  %v597_v17 = vld [vmem:[#allocation12 + $0x1d8] sm:$0xff]  ;;  %789 = vst [vmem:[#allocation2 + $0xd8] sm:$0xff] %v757_v12  ;;  %v723_v21 = vsel %vm531_vm10, %v659_v15, 0.0  ;;  %v660_v22 = vmul.f32 2.0, %v596_v7  ;;  %vm533_vm14 = vcmp.ge.f32.partialorder %v469_v11, 0.5 }
  0xe2   : > { %v601_v18 = vld [vmem:[#allocation12 + $0x1f8] sm:$0xff]  ;;  %v664_v23 = vmul.f32 2.0, %v600_v10  ;;  %790 = vst [vmem:[#allocation2 + $0xe0] sm:$0xff] %v758_v19  ;;  %v727_v24 = vsel %vm535_vm11, %v663_v20, 0.0  ;;  %vm537_vm15 = vcmp.ge.f32.partialorder %v473_v16, 0.5  ;;  %v661_v25 = vmul.f32 2.0, %v597_v17 }
  0xe3   : > { %v665_v26 = vmul.f32 2.0, %v601_v18  ;;  %v759_v27 = vpack.c.bf16 %v727_v24, %v723_v21  ;;  %v724_v28 = vsel %vm532_vm12, %v660_v22, 0.0 }
  0xe4   : > { %v728_v29 = vsel %vm536_vm13, %v664_v23, 0.0  ;;  %v725_v31 = vsel %vm533_vm14, %v661_v25, 0.0 }
  0xe5   : > { %v760_v30 = vpack.c.bf16 %v728_v29, %v724_v28  ;;  %v729_v32 = vsel %vm537_vm15, %v665_v26, 0.0  ;;  %791 = vst [vmem:[#allocation2 + $0xe8] sm:$0xff] %v759_v27 }
  0xe6   : > { %v761_v33 = vpack.c.bf16 %v729_v32, %v725_v31 }
  0xe7   : > { %792 = vst [vmem:[#allocation2 + $0xf0] sm:$0xff] %v760_v30 }
  0xe8   : > { %793 = vst [vmem:[#allocation2 + $0xf8] sm:$0xff] %v761_v33 }
  0xe9 PF: > { %v2030_v34 = vld [vmem:[#allocation11 + $0x4] ss:$16 sps:$4 sm:$0xff]   ;;  %v2032_v35 = vld [vmem:[#allocation11 + $0xc] ss:$16 sps:$4 sm:$0xff]   ;;  %v3137_v36 = vmov 0   ;;  %s2434_s24 = smov [#allocation16]  }
  0xea   : > { %1060 = vmatprep.mubr.bf16.mxu0 %v3137_v36  ;;  %1113 = vmatprep.mubr.bf16.mxu1 %v3137_v36  ;;  %v2034_v37 = vld [vmem:[#allocation11] ss:$16 sps:$4 sm:$0xff]   ;;  %v2035_v38 = vld [vmem:[#allocation11 + $0x8] ss:$16 sps:$4 sm:$0xff]   ;;  %v2036_v39 = vld [vmem:[#allocation11 + $0x24] ss:$16 sps:$4 sm:$0xff]  }
  0xeb   : > { %1028 = vmatprep.subr.bf16.mxu0 %v2030_v34  ;;  %1081 = vmatprep.subr.bf16.mxu1 %v2032_v35  ;;  %v2038_v40 = vld [vmem:[#allocation11 + $0x2c] ss:$16 sps:$4 sm:$0xff]   ;;  %v2040_v41 = vld [vmem:[#allocation11 + $0x20] ss:$16 sps:$4 sm:$0xff]   ;;  %v2041_v42 = vld [vmem:[#allocation11 + $0x28] ss:$16 sps:$4 sm:$0xff]  }
  0xec   : > { %1029 = vmatpush1.bf16.msra.mxu0 %v2034_v37  ;;  %1082 = vmatpush1.bf16.msra.mxu1 %v2035_v38  ;;  %v2042_v43 = vld [vmem:[#allocation11 + $0x44] ss:$16 sps:$4 sm:$0xff]   ;;  %v2044_v44 = vld [vmem:[#allocation11 + $0x4c] ss:$16 sps:$4 sm:$0xff]   ;;  %v2046_v45 = vld [vmem:[#allocation11 + $0x40] ss:$16 sps:$4 sm:$0xff]  }
  0xed   : > { %1030 = vmatprep.subr.bf16.mxu0 %v2036_v39  ;;  %1083 = vmatprep.subr.bf16.mxu1 %v2038_v40  ;;  %v2047_v46 = vld [vmem:[#allocation11 + $0x48] ss:$16 sps:$4 sm:$0xff]   ;;  %v2048_v47 = vld [vmem:[#allocation11 + $0x64] ss:$16 sps:$4 sm:$0xff]   ;;  %v2050_v48 = vld [vmem:[#allocation11 + $0x6c] ss:$16 sps:$4 sm:$0xff]   ;;  %v836_v40 = vlaneseq }
  0xee   : > { %v2052_v49 = vld [vmem:[#allocation11 + $0x60] ss:$16 sps:$4 sm:$0xff]   ;;  %v2053_v50 = vld [vmem:[#allocation11 + $0x68] ss:$16 sps:$4 sm:$0xff]   ;;  %v2054_v51 = vld [vmem:[#allocation11 + $0x84] ss:$16 sps:$4 sm:$0xff]  }
  0xef   : > { %v2056_v52 = vld [vmem:[#allocation11 + $0x8c] ss:$16 sps:$4 sm:$0xff]   ;;  %v2058_v53 = vld [vmem:[#allocation11 + $0x80] ss:$16 sps:$4 sm:$0xff]   ;;  %v2059_v54 = vld [vmem:[#allocation11 + $0x88] ss:$16 sps:$4 sm:$0xff]  }
  0xf0   : > { %1031 = vmatpush1.bf16.msra.mxu0 %v2040_v41  ;;  %1084 = vmatpush1.bf16.msra.mxu1 %v2041_v42  ;;  %v2060_v55 = vld [vmem:[#allocation11 + $0xa4] ss:$16 sps:$4 sm:$0xff]   ;;  %v2062_v56 = vld [vmem:[#allocation11 + $0xac] ss:$16 sps:$4 sm:$0xff]   ;;  %v2064_v57 = vld [vmem:[#allocation11 + $0xa0] ss:$16 sps:$4 sm:$0xff]  }
  0xf1   : > { %1032 = vmatprep.subr.bf16.mxu0 %v2042_v43  ;;  %1085 = vmatprep.subr.bf16.mxu1 %v2044_v44  ;;  %v2065_v58 = vld [vmem:[#allocation11 + $0xa8] ss:$16 sps:$4 sm:$0xff]   ;;  %v2066_v59 = vld [vmem:[#allocation11 + $0xc4] ss:$16 sps:$4 sm:$0xff]   ;;  %v2068_v60 = vld [vmem:[#allocation11 + $0xcc] ss:$16 sps:$4 sm:$0xff]  }
  0xf2   : > { %v2070_v61 = vld [vmem:[#allocation11 + $0xc0] ss:$16 sps:$4 sm:$0xff]   ;;  %v2071_v62 = vld [vmem:[#allocation11 + $0xc8] ss:$16 sps:$4 sm:$0xff]   ;;  %v2072_v63 = vld [vmem:[#allocation11 + $0xe4] ss:$16 sps:$4 sm:$0xff]  }
  0xf3   : > { %v2074_v0 = vld [vmem:[#allocation11 + $0xec] ss:$16 sps:$4 sm:$0xff]   ;;  %v2076_v1 = vld [vmem:[#allocation11 + $0xe0] ss:$16 sps:$4 sm:$0xff]   ;;  %v2077_v2 = vld [vmem:[#allocation11 + $0xe8] ss:$16 sps:$4 sm:$0xff]  }
  0xf4   : > { %1033 = vmatpush1.bf16.msra.mxu0 %v2046_v45  ;;  %1086 = vmatpush1.bf16.msra.mxu1 %v2047_v46  ;;  %v2770_v3 = vld [vmem:[#allocation2 + $0x8] sm:$0xff]  ;;  %v2772_v4 = vld [vmem:[#allocation2 + $0x18] sm:$0xff]  ;;  %v2078_v5 = vld [vmem:[%s2693_s27] sm:$0xff]   ;;  %v837_v41 = vshrl.u32 %v836_v40, 7  ;;  %s1700_s25 = sshll.u32 %s2434_s24, 4  ;;  %s1919_s29 = sshll.u32 %s2510_s13, 9  ;;  %s1701_s25 = int_to_ptr.vmem [resolvable:$true] %s1700_s25 }
  0xf5   : > { %1034 = vmatprep.subr.bf16.mxu0 %v2048_v47  ;;  %1087 = vmatprep.subr.bf16.mxu1 %v2050_v48  ;;  %v2777_v6 = vld [vmem:[#allocation2] sm:$0xff]  ;;  %v2779_v7 = vld [vmem:[#allocation2 + $0x10] sm:$0xff]  ;;  %v2781_v8 = vld [vmem:[#allocation2 + $0x28] sm:$0xff]  ;;  %s1686_s21 = sshll.u32 %s2708_s26, 4  ;;  %s2435_s20 = smov [#allocation18]   ;;  %s3028_s21 = int_to_ptr.vmem [resolvable:$true] %s1686_s21 }
  0xf6   : > { %v2783_v9 = vld [vmem:[#allocation2 + $0x38] sm:$0xff]  ;;  %v2789_v10 = vld [vmem:[#allocation2 + $0x20] sm:$0xff]  ;;  %v2791_v11 = vld [vmem:[#allocation2 + $0x30] sm:$0xff]  ;;  %v838_v42 = vsub.s32 0, %v837_v41  ;;  %v846_v43 = vsub.s32 2, %v837_v41  ;;  %v850_v45 = vsub.s32 3, %v837_v41  ;;  %p2293_p13 = scmp.lt.s32.totalorder %s1701_s25, %s1701_s25 }
  0xf7   : > { %v2793_v12 = vld [vmem:[#allocation2 + $0x48] sm:$0xff]  ;;  %v2795_v13 = vld [vmem:[#allocation2 + $0x58] sm:$0xff]  ;;  %v2804_v15 = vld [vmem:[#allocation2 + $0x40] sm:$0xff]  ;;  %v842_v46 = vsub.s32 1, %v837_v41  ;;  %s1711_s18 = sshll.u32 %s2435_s20, 4  ;;  %s2286_s17 = scalar_lea.vmem %s1701_s25, 128  ;;  %s3031_s18 = int_to_ptr.vmem [resolvable:$true] %s1711_s18 }
  0xf8   : > { %1035 = vmatpush1.bf16.msra.mxu0 %v2052_v49  ;;  %1088 = vmatpush1.bf16.msra.mxu1 %v2053_v50  ;;  %v2079_v14 = vld [vmem:[%s2693_s27 + $0x8] sm:$0xff]   ;;  %v2806_v16 = vld [vmem:[#allocation2 + $0x50] sm:$0xff]  ;;  %v2816_v19 = vld [vmem:[#allocation2 + $0x60] sm:$0xff]  ;;  %s3026_s27 = scalar_lea.hbm %s3127_s7, %s1919_s29  ;;  %p2287_p3 = scmp.ne.s32.totalorder %s1701_s25, %s2286_s17 }
  0xf9   : > { %1036 = vmatprep.subr.bf16.mxu0 %v2054_v51  ;;  %1089 = vmatprep.subr.bf16.mxu1 %v2056_v52  ;;  %v2808_v17 = vld [vmem:[#allocation2 + $0x68] sm:$0xff]  ;;  %v2810_v18 = vld [vmem:[#allocation2 + $0x78] sm:$0xff]  ;;  %v2818_v20 = vld [vmem:[#allocation2 + $0x70] sm:$0xff]  ;;  %p3175_p7 = scmp.eq.s32.totalorder %s2510_s13, 1  ;;  %p2294_p5 = scmp.lt.s32.totalorder %s2286_s17, %s2286_s17 }
  0xfa   : > { %v2820_v21 = vld [vmem:[#allocation2 + $0x88] sm:$0xff]  ;;  %v2822_v22 = vld [vmem:[#allocation2 + $0x98] sm:$0xff]  ;;  %v2830_v23 = vld [vmem:[#allocation2 + $0x80] sm:$0xff] }
  0xfb   : > { %v2832_v24 = vld [vmem:[#allocation2 + $0x90] sm:$0xff]  ;;  %v2834_v25 = vld [vmem:[#allocation2 + $0xa8] sm:$0xff]  ;;  %v2836_v26 = vld [vmem:[#allocation2 + $0xb8] sm:$0xff]  ;;  %p2288_p10 = pnand %p2287_p3, %p3175_p7  ;;  %p2295_p1 = por %p2294_p5, %p2293_p13 }
  0xfc   : > { %1037 = vmatpush1.bf16.msra.mxu0 %v2058_v53  ;;  %1090 = vmatpush1.bf16.msra.mxu1 %v2059_v54  ;;  %v2842_v27 = vld [vmem:[#allocation2 + $0xa0] sm:$0xff]  ;;  %v2844_v28 = vld [vmem:[#allocation2 + $0xb0] sm:$0xff]  ;;  %v2846_v29 = vld [vmem:[#allocation2 + $0xc8] sm:$0xff] }
  0xfd   : > { %1038 = vmatprep.subr.bf16.mxu0 %v2060_v55  ;;  %1091 = vmatprep.subr.bf16.mxu1 %v2062_v56  ;;  %v2848_v30 = vld [vmem:[#allocation2 + $0xd8] sm:$0xff]  ;;  %v2854_v31 = vld [vmem:[#allocation2 + $0xc0] sm:$0xff]  ;;  %v2856_v32 = vld [vmem:[#allocation2 + $0xd0] sm:$0xff]  ;;  %p2289_p0 = pneg %p2288_p10 }
  0xfe   : > { %v2858_v33 = vld [vmem:[#allocation2 + $0xe8] sm:$0xff]  ;;  %v2860_v34 = vld [vmem:[#allocation2 + $0xf8] sm:$0xff]  ;;  %v1182_v35 = vld [vmem:[#allocation4] sm:$0xff] }
  0xff   : > { %v2866_v37 = vld [vmem:[#allocation2 + $0xe0] sm:$0xff]  ;;  %v2868_v38 = vld [vmem:[#allocation2 + $0xf0] sm:$0xff]  ;;  %v1183_v39 = vpack.c.bf16 %v1182_v35, %v1182_v35  ;;  %p2296_p12 = pnand %p2295_p1, %p2289_p0 }
 0x100   : > { %1039 = vmatpush1.bf16.msra.mxu0 %v2064_v57  ;;  %1092 = vmatpush1.bf16.msra.mxu1 %v2065_v58  ;;  %v834_v44 = vld [vmem:[#allocation14] sm:$0xf] }
 0x101   : > { %1040 = vmatprep.subr.bf16.mxu0 %v2066_v59  ;;  %1093 = vmatprep.subr.bf16.mxu1 %v2068_v60  ;;  %v839_v47 = vrot.slane %v834_v44, %v838_v42  ;;  %v847_v48 = vrot.slane %v834_v44, %v846_v43  ;;  %v851_v51 = vrot.slane %v834_v44, %v850_v45 }
 0x102   : > { %v843_v54 = vrot.slane %v834_v44, %v842_v46 }
 0x104   : > { %1041 = vmatpush1.bf16.msra.mxu0 %v2070_v61  ;;  %1094 = vmatpush1.bf16.msra.mxu1 %v2071_v62 }
 0x105   : > { %1042 = vmatprep.subr.bf16.mxu0 %v2072_v63  ;;  %1095 = vmatprep.subr.bf16.mxu1 %v2074_v0 }
 0x108   : > { %1043 = vmatpush1.bf16.msra.mxu0 %v2076_v1  ;;  %1096 = vmatpush1.bf16.msra.mxu1 %v2077_v2 }
 0x109   : > { %1188 = vmatprep.subr.bf16.mxu0 %v2770_v3  ;;  %1229 = vmatprep.subr.bf16.mxu1 %v2772_v4 }
 0x10b   : > { %1061 = vmatmul.mubr.bf16.vlgmr.msra.gmra.mrb[0].mxu0 %v2078_v5  ;;  %1114 = vmatmul.mubr.bf16.vlgmr.msra.gmra.mrb[0].mxu1 %v2078_v5 }
 0x10c   : > { %1189 = vmatpush1.bf16.msra.mxu0 %v2777_v6  ;;  %1230 = vmatpush1.bf16.msra.mxu1 %v2779_v7 }
 0x10d   : > { %1190 = vmatprep.subr.bf16.mxu0 %v2781_v8  ;;  %1231 = vmatprep.subr.bf16.mxu1 %v2783_v9 }
 0x10e   : > { %1070 = vmatprep.mubr.bf16.mxu0 %v3137_v36  ;;  %1123 = vmatprep.mubr.bf16.mxu1 %v3137_v36 }
 0x110   : > { %1191 = vmatpush1.bf16.msra.mxu0 %v2789_v10  ;;  %1232 = vmatpush1.bf16.msra.mxu1 %v2791_v11 }
 0x111   : > { %1192 = vmatprep.subr.bf16.mxu0 %v2793_v12  ;;  %1233 = vmatprep.subr.bf16.mxu1 %v2795_v13 }
 0x113   : > { %1071 = vmatmul.mubr.bf16.gmra.mrb[4].mxu0 %v2079_v14  ;;  %1124 = vmatmul.mubr.bf16.gmra.mrb[4].mxu1 %v2079_v14 }
 0x114   : > { %1193 = vmatpush1.bf16.msra.mxu0 %v2804_v15  ;;  %1234 = vmatpush1.bf16.msra.mxu1 %v2806_v16 }
 0x115   : > { %1194 = vmatprep.subr.bf16.mxu0 %v2808_v17  ;;  %1235 = vmatprep.subr.bf16.mxu1 %v2810_v18 }
 0x116   : > { %1220 = vmatprep.mubr.bf16.mxu0 %v3137_v36  ;;  %1261 = vmatprep.mubr.bf16.mxu1 %v3137_v36 }
 0x118   : > { %1195 = vmatpush1.bf16.msra.mxu0 %v2816_v19  ;;  %1236 = vmatpush1.bf16.msra.mxu1 %v2818_v20 }
 0x119   : > { %1196 = vmatprep.subr.bf16.mxu0 %v2820_v21  ;;  %1237 = vmatprep.subr.bf16.mxu1 %v2822_v22 }
 0x11c   : > { %1197 = vmatpush1.bf16.msra.mxu0 %v2830_v23  ;;  %1238 = vmatpush1.bf16.msra.mxu1 %v2832_v24 }
 0x11d   : > { %1198 = vmatprep.subr.bf16.mxu0 %v2834_v25  ;;  %1239 = vmatprep.subr.bf16.mxu1 %v2836_v26 }
 0x120   : > { %1199 = vmatpush1.bf16.msra.mxu0 %v2842_v27  ;;  %1240 = vmatpush1.bf16.msra.mxu1 %v2844_v28 }
 0x121   : > { %1200 = vmatprep.subr.bf16.mxu0 %v2846_v29  ;;  %1241 = vmatprep.subr.bf16.mxu1 %v2848_v30 }
 0x124   : > { %1201 = vmatpush1.bf16.msra.mxu0 %v2854_v31  ;;  %1242 = vmatpush1.bf16.msra.mxu1 %v2856_v32 }
 0x125   : > { %1202 = vmatprep.subr.bf16.mxu0 %v2858_v33  ;;  %1243 = vmatprep.subr.bf16.mxu1 %v2860_v34 }
 0x128   : > { %1203 = vmatpush1.bf16.msra.mxu0 %v2866_v37  ;;  %1244 = vmatpush1.bf16.msra.mxu1 %v2868_v38 }
 0x129   : > { %1309 = vmatprep.subr.bf16.mxu0 %v2770_v3  ;;  %1350 = vmatprep.subr.bf16.mxu1 %v2772_v4 }
 0x12b   : > { %1221 = vmatmul.mubr.bf16.vlgmr.msra.gmra.mrb[8].mxu0 %v1183_v39  ;;  %1262 = vmatmul.mubr.bf16.vlgmr.msra.gmra.mrb[8].mxu1 %v1183_v39 }
 0x12c   : > { %1310 = vmatpush1.bf16.msra.mxu0 %v2777_v6  ;;  %1351 = vmatpush1.bf16.msra.mxu1 %v2779_v7 }
 0x12d   : > { %1311 = vmatprep.subr.bf16.mxu0 %v2781_v8  ;;  %1352 = vmatprep.subr.bf16.mxu1 %v2783_v9 }
 0x12e   : > { %1341 = vmatprep.mubr.bf16.mxu0 %v3137_v36  ;;  %1382 = vmatprep.mubr.bf16.mxu1 %v3137_v36 }
 0x130   : > { %1312 = vmatpush1.bf16.msra.mxu0 %v2789_v10  ;;  %1353 = vmatpush1.bf16.msra.mxu1 %v2791_v11 }
 0x131   : > { %1313 = vmatprep.subr.bf16.mxu0 %v2793_v12  ;;  %1354 = vmatprep.subr.bf16.mxu1 %v2795_v13 }
 0x134   : > { %1314 = vmatpush1.bf16.msra.mxu0 %v2804_v15  ;;  %1355 = vmatpush1.bf16.msra.mxu1 %v2806_v16 }
 0x135   : > { %1315 = vmatprep.subr.bf16.mxu0 %v2808_v17  ;;  %1356 = vmatprep.subr.bf16.mxu1 %v2810_v18 }
 0x138   : > { %1316 = vmatpush1.bf16.msra.mxu0 %v2816_v19  ;;  %1357 = vmatpush1.bf16.msra.mxu1 %v2818_v20 }
 0x139   : > { %1317 = vmatprep.subr.bf16.mxu0 %v2820_v21  ;;  %1358 = vmatprep.subr.bf16.mxu1 %v2822_v22 }
 0x13c   : > { %1318 = vmatpush1.bf16.msra.mxu0 %v2830_v23  ;;  %1359 = vmatpush1.bf16.msra.mxu1 %v2832_v24 }
 0x13d   : > { %1319 = vmatprep.subr.bf16.mxu0 %v2834_v25  ;;  %1360 = vmatprep.subr.bf16.mxu1 %v2836_v26 }
 0x140   : > { %1320 = vmatpush1.bf16.msra.mxu0 %v2842_v27  ;;  %1361 = vmatpush1.bf16.msra.mxu1 %v2844_v28 }
 0x141   : > { %1321 = vmatprep.subr.bf16.mxu0 %v2846_v29  ;;  %1362 = vmatprep.subr.bf16.mxu1 %v2848_v30 }
 0x144   : > { %1322 = vmatpush1.bf16.msra.mxu0 %v2854_v31  ;;  %1363 = vmatpush1.bf16.msra.mxu1 %v2856_v32 }
 0x145   : > { %1323 = vmatprep.subr.bf16.mxu0 %v2858_v33  ;;  %1364 = vmatprep.subr.bf16.mxu1 %v2860_v34 }
 0x148   : > { %1324 = vmatpush1.bf16.msra.mxu0 %v2866_v37  ;;  %1365 = vmatpush1.bf16.msra.mxu1 %v2868_v38 }
 0x149   : > { %1431 = vmatprep.subr.bf16.mxu0 %v2770_v3  ;;  %1472 = vmatprep.subr.bf16.mxu1 %v2772_v4 }
 0x1de   : > { %v1062_v49 = vpop.f32.mrb[0].mxu0  ;;  %v1115_v50 = vpop.f32.mrb[0].mxu1 }
 0x1df   : > { %v1064_v52 = vpop.f32.mrb[1].mxu0  ;;  %v1117_v53 = vpop.f32.mrb[1].mxu1 }
 0x1e0   : > { %v1066_v55 = vpop.f32.mrb[2].mxu0  ;;  %v1119_v56 = vpop.f32.mrb[2].mxu1 }
 0x1e1   : > { %v2908_v57 = vadd.f32 %v1066_v55, %v839_v47  ;;  %v1068_v58 = vpop.f32.mrb[3].mxu0  ;;  %v2910_v59 = vadd.f32 %v1119_v56, %v847_v48  ;;  %v1121_v60 = vpop.f32.mrb[3].mxu1  ;;  %v1063_v56 = vadd.f32 %v1062_v49, %v839_v47 }
 0x1e2   : > { %v2912_v61 = vadd.f32 %v1068_v58, %v843_v54  ;;  %v2914_v62 = vadd.f32 %v1121_v60, %v851_v51  ;;  %v1116_v58 = vadd.f32 %v1115_v50, %v847_v48  ;;  %v1065_v60 = vadd.f32 %v1064_v52, %v843_v54 }
 0x1e6   : > { %v1072_v63 = vpop.f32.mrb[4].mxu0  ;;  %v1125_v0 = vpop.f32.mrb[4].mxu1 }
 0x1e7   : > { %v2916_v1 = vadd.f32 %v1072_v63, %v839_v47  ;;  %v1074_v2 = vpop.f32.mrb[5].mxu0  ;;  %v2918_v5 = vadd.f32 %v1125_v0, %v847_v48  ;;  %v1127_v14 = vpop.f32.mrb[5].mxu1  ;;  %v1118_v63 = vadd.f32 %v1117_v53, %v851_v51 }
 0x1e8   : > { %v2920_v35 = vadd.f32 %v1074_v2, %v843_v54  ;;  %v1076_v39 = vpop.f32.mrb[6].mxu0  ;;  %v2922_v40 = vadd.f32 %v1127_v14, %v851_v51  ;;  %v1129_v41 = vpop.f32.mrb[6].mxu1 }
 0x1e9   : > { %3160 = vst [vmem:[#allocation27_spill] sm:$0xff] %v2916_v1  ;;  %3161 = vst [vmem:[#allocation28_spill] sm:$0xff] %v2918_v5  ;;  %v2924_v42 = vadd.f32 %v1076_v39, %v839_v47  ;;  %v1078_v43 = vpop.f32.mrb[7].mxu0  ;;  %v2926_v44 = vadd.f32 %v1129_v41, %v847_v48  ;;  %v1131_v45 = vpop.f32.mrb[7].mxu1 }
 0x1ea   : > { %3162 = vst [vmem:[#allocation29_spill] sm:$0xff] %v2920_v35  ;;  %3163 = vst [vmem:[#allocation30_spill] sm:$0xff] %v2922_v40  ;;  %v2928_v46 = vadd.f32 %v1078_v43, %v843_v54  ;;  %v2930_v55 = vadd.f32 %v1131_v45, %v851_v51  ;;  %v1293_v54 = vld [vmem:[#allocation5] sm:$0xff] }
 0x1eb   : > { %3164 = vst [vmem:[#allocation31_spill] sm:$0xff] %v2924_v42  ;;  %3165 = vst [vmem:[#allocation32_spill] sm:$0xff] %v2926_v44 }
 0x1ec   : > { %3166 = vst [vmem:[#allocation33_spill] sm:$0xff] %v2928_v46 }
 0x1fe   : > { %v1222_v0 = vpop.f32.mrb[8].mxu0  ;;  %v1263_v2 = vpop.f32.mrb[8].mxu1 }
 0x1ff   : > { %v1270_v36 = vadd.f32 %v1222_v0, %v1063_v56  ;;  %v1272_v14 = vadd.f32 %v1263_v2, %v1116_v58  ;;  %v1224_v40 = vpop.f32.mrb[9].mxu0  ;;  %v1265_v35 = vpop.f32.mrb[9].mxu1  ;;  %v3167_v58 = vmov 0  }
 0x200   : > { %v1271_v39 = vadd.f32 %v1224_v40, %v1065_v60  ;;  %v1273_v42 = vadd.f32 %v1265_v35, %v1118_v63  ;;  %v1226_v5 = vpop.f32.mrb[10].mxu0  ;;  %v1267_v41 = vpop.f32.mrb[10].mxu1 }
 0x201   : > { %v1894_v44 = vmul.f32 -1.442695, %v1270_v36  ;;  %v1227_v1 = vpop.f32.mrb[11].mxu0  ;;  %v1268_v43 = vpop.f32.mrb[11].mxu1 }
 0x202   : > { %v1895_v46 = vmul.f32 -1.442695, %v1271_v39  ;;  %v1896_v47 = vmul.f32 -1.442695, %v1273_v42 }
 0x203   : > { %2080 = vpow2.f32 %v1894_v44 }
 0x204   : > { %2082 = vpow2.f32 %v1895_v46 }
 0x205   : > { %2084 = vpow2.f32 %v1896_v47 }
 0x206   : > { %2086 = vtanh.f32 %v1272_v14 }
 0x20d   : > { %v2081_v48 = vpop.eup %2080 }
 0x20e   : > { %v2083_v49 = vpop.eup %2082  ;;  %v1277_v50 = vadd.f32 1.0, %v2081_v48 }
 0x20f   : > { %v1283_v51 = vadd.f32 1.0, %v2083_v49  ;;  %v2085_v52 = vpop.eup %2084 }
 0x210   : > { %2088 = vrcp.f32 %v1277_v50  ;;  %v2087_v53 = vpop.eup %2086  ;;  %v1290_v35 = vadd.f32 1.0, %v2085_v52 }
 0x211   : > { %2090 = vrcp.f32 %v1283_v51 }
 0x212   : > { %2092 = vrcp.f32 %v1290_v35 }
 0x21a   : > { %v2089_v5 = vpop.eup %2088 }
 0x21b   : > { %v2091_v36 = vpop.eup %2090  ;;  %v1295_v1 = vmul.f32 %v2089_v5, %v2087_v53 }
 0x21c   : > { %v1294_v40 = vmul.f32 %v2091_v36, %v1293_v54  ;;  %v2093_v42 = vpop.eup %2092 }
 0x21e   : > { %v2932_v44 = vadd.f32 %v1295_v1, %v1294_v40 }
 0x220   : > { %2094 = vtanh.f32 %v2932_v44 }
 0x22a   : > { %v2095_v45 = vpop.eup %2094 }
 0x22b   : > { %v1298_v46 = vmul.f32 %v2095_v45, %v2093_v42 }
 0x22d   : > { %1301 = vst [vmem:[%s2708_s26] sm:$0xff] %v1298_v46  ;;  %v1303_v56 = vpack.c.bf16 %v1298_v46, %v1298_v46 }
 0x22f   : > { %1342 = vmatmul.mubr.bf16.vlgmr.msra.gmra.mrb[12].mxu0 %v1303_v56  ;;  %1383 = vmatmul.mubr.bf16.vlgmr.msra.gmra.mrb[12].mxu1 %v1303_v56 }
 0x230   : > { %1432 = vmatpush1.bf16.msra.mxu0 %v2777_v6  ;;  %1473 = vmatpush1.bf16.msra.mxu1 %v2779_v7 }
 0x231   : > { %1433 = vmatprep.subr.bf16.mxu0 %v2781_v8  ;;  %1474 = vmatprep.subr.bf16.mxu1 %v2783_v9 }
 0x232   : > { %1463 = vmatprep.mubr.bf16.mxu0 %v3167_v58  ;;  %1504 = vmatprep.mubr.bf16.mxu1 %v3167_v58 }
 0x234   : > { %1434 = vmatpush1.bf16.msra.mxu0 %v2789_v10  ;;  %1475 = vmatpush1.bf16.msra.mxu1 %v2791_v11 }
 0x235   : > { %1435 = vmatprep.subr.bf16.mxu0 %v2793_v12  ;;  %1476 = vmatprep.subr.bf16.mxu1 %v2795_v13 }
 0x238   : > { %1436 = vmatpush1.bf16.msra.mxu0 %v2804_v15  ;;  %1477 = vmatpush1.bf16.msra.mxu1 %v2806_v16 }
 0x239   : > { %1437 = vmatprep.subr.bf16.mxu0 %v2808_v17  ;;  %1478 = vmatprep.subr.bf16.mxu1 %v2810_v18 }
 0x23c   : > { %1438 = vmatpush1.bf16.msra.mxu0 %v2816_v19  ;;  %1479 = vmatpush1.bf16.msra.mxu1 %v2818_v20 }
 0x23d   : > { %1439 = vmatprep.subr.bf16.mxu0 %v2820_v21  ;;  %1480 = vmatprep.subr.bf16.mxu1 %v2822_v22 }
 0x240   : > { %1440 = vmatpush1.bf16.msra.mxu0 %v2830_v23  ;;  %1481 = vmatpush1.bf16.msra.mxu1 %v2832_v24 }
 0x241   : > { %1441 = vmatprep.subr.bf16.mxu0 %v2834_v25  ;;  %1482 = vmatprep.subr.bf16.mxu1 %v2836_v26 }
 0x244   : > { %1442 = vmatpush1.bf16.msra.mxu0 %v2842_v27  ;;  %1483 = vmatpush1.bf16.msra.mxu1 %v2844_v28 }
 0x245   : > { %1443 = vmatprep.subr.bf16.mxu0 %v2846_v29  ;;  %1484 = vmatprep.subr.bf16.mxu1 %v2848_v30 }
 0x248   : > { %1444 = vmatpush1.bf16.msra.mxu0 %v2854_v31  ;;  %1485 = vmatpush1.bf16.msra.mxu1 %v2856_v32 }
 0x249   : > { %1445 = vmatprep.subr.bf16.mxu0 %v2858_v33  ;;  %1486 = vmatprep.subr.bf16.mxu1 %v2860_v34 }
 0x24c   : > { %1446 = vmatpush1.bf16.msra.mxu0 %v2866_v37  ;;  %1487 = vmatpush1.bf16.msra.mxu1 %v2868_v38 }
 0x24d   : > { %1553 = vmatprep.subr.bf16.mxu0 %v2770_v3  ;;  %1594 = vmatprep.subr.bf16.mxu1 %v2772_v4 }
 0x302   : > { %v1343_v60 = vpop.f32.mrb[12].mxu0  ;;  %v1384_v63 = vpop.f32.mrb[12].mxu1 }
 0x303   : > { %v1391_v0 = vadd.f32 %v1343_v60, %v2908_v57  ;;  %v1393_v2 = vadd.f32 %v1384_v63, %v2910_v59  ;;  %v1345_v14 = vpop.f32.mrb[13].mxu0  ;;  %v1386_v39 = vpop.f32.mrb[13].mxu1 }
 0x304   : > { %v1392_v41 = vadd.f32 %v1345_v14, %v2912_v61  ;;  %v1394_v43 = vadd.f32 %v1386_v39, %v2914_v62  ;;  %v1347_v47 = vpop.f32.mrb[14].mxu0  ;;  %v1388_v48 = vpop.f32.mrb[14].mxu1  ;;  %v3172_v39 = vld [vmem:[#allocation31_spill] sm:$0xff] }
 0x305   : > { %v1897_v49 = vmul.f32 -1.442695, %v1391_v0  ;;  %v1348_v50 = vpop.f32.mrb[15].mxu0  ;;  %v1389_v51 = vpop.f32.mrb[15].mxu1 }
 0x306   : > { %v1898_v3 = vmul.f32 -1.442695, %v1392_v41  ;;  %v1899_v4 = vmul.f32 -1.442695, %v1394_v43  ;;  %v3173_v43 = vld [vmem:[#allocation32_spill] sm:$0xff]  ;;  %v3174_v50 = vld [vmem:[#allocation33_spill] sm:$0xff] }
 0x307   : > { %2096 = vpow2.f32 %v1897_v49 }
 0x308   : > { %2098 = vpow2.f32 %v1898_v3 }
 0x309   : > { %2100 = vpow2.f32 %v1899_v4 }
 0x30a   : > { %2102 = vtanh.f32 %v1393_v2 }
 0x311   : > { %v2097_v52 = vpop.eup %2096 }
 0x312   : > { %v2099_v53 = vpop.eup %2098  ;;  %v1398_v57 = vadd.f32 1.0, %v2097_v52 }
 0x313   : > { %v1404_v59 = vadd.f32 1.0, %v2099_v53  ;;  %v2101_v61 = vpop.eup %2100 }
 0x314   : > { %2104 = vrcp.f32 %v1398_v57  ;;  %v2103_v62 = vpop.eup %2102  ;;  %v1411_v1 = vadd.f32 1.0, %v2101_v61 }
 0x315   : > { %2106 = vrcp.f32 %v1404_v59 }
 0x316   : > { %2108 = vrcp.f32 %v1411_v1 }
 0x31e   : > { %v2105_v54 = vpop.eup %2104 }
 0x31f   : > { %v2107_v5 = vpop.eup %2106  ;;  %v1416_v36 = vmul.f32 %v2105_v54, %v2103_v62 }
 0x320   : > { %v1415_v35 = vmul.f32 %v2107_v5, %v2932_v44  ;;  %v2109_v42 = vpop.eup %2108 }
 0x322   : > { %v2975_v40 = vadd.f32 %v1416_v36, %v1415_v35 }
 0x324   : > { %2110 = vtanh.f32 %v2975_v40 }
 0x32e   : > { %v2111_v45 = vpop.eup %2110 }
 0x32f   : > { %v1419_v46 = vmul.f32 %v2111_v45, %v2109_v42 }
 0x331   : > { %1900 = vst [vmem:[%s2708_s26 + $0x8] sm:$0xff] %v1419_v46  ;;  %v1425_v56 = vpack.c.bf16 %v1419_v46, %v1419_v46 }
 0x333   : > { %1464 = vmatmul.mubr.bf16.vlgmr.msra.gmra.mrb[16].mxu0 %v1425_v56  ;;  %1505 = vmatmul.mubr.bf16.vlgmr.msra.gmra.mrb[16].mxu1 %v1425_v56 }
 0x334   : > { %1554 = vmatpush1.bf16.msra.mxu0 %v2777_v6  ;;  %1595 = vmatpush1.bf16.msra.mxu1 %v2779_v7 }
 0x335   : > { %1555 = vmatprep.subr.bf16.mxu0 %v2781_v8  ;;  %1596 = vmatprep.subr.bf16.mxu1 %v2783_v9  ;;  %v3168_v8 = vld [vmem:[#allocation27_spill] sm:$0xff] }
 0x336   : > { %1585 = vmatprep.mubr.bf16.mxu0 %v3167_v58  ;;  %1626 = vmatprep.mubr.bf16.mxu1 %v3167_v58 }
 0x338   : > { %1556 = vmatpush1.bf16.msra.mxu0 %v2789_v10  ;;  %1597 = vmatpush1.bf16.msra.mxu1 %v2791_v11  ;;  %v3169_v10 = vld [vmem:[#allocation28_spill] sm:$0xff] }
 0x339   : > { %1557 = vmatprep.subr.bf16.mxu0 %v2793_v12  ;;  %1598 = vmatprep.subr.bf16.mxu1 %v2795_v13 }
 0x33c   : > { %1558 = vmatpush1.bf16.msra.mxu0 %v2804_v15  ;;  %1599 = vmatpush1.bf16.msra.mxu1 %v2806_v16  ;;  %v3170_v15 = vld [vmem:[#allocation29_spill] sm:$0xff] }
 0x33d   : > { %1559 = vmatprep.subr.bf16.mxu0 %v2808_v17  ;;  %1600 = vmatprep.subr.bf16.mxu1 %v2810_v18  ;;  %v3171_v17 = vld [vmem:[#allocation30_spill] sm:$0xff] }
 0x340   : > { %1560 = vmatpush1.bf16.msra.mxu0 %v2816_v19  ;;  %1601 = vmatpush1.bf16.msra.mxu1 %v2818_v20 }
 0x341   : > { %1561 = vmatprep.subr.bf16.mxu0 %v2820_v21  ;;  %1602 = vmatprep.subr.bf16.mxu1 %v2822_v22 }
 0x344   : > { %1562 = vmatpush1.bf16.msra.mxu0 %v2830_v23  ;;  %1603 = vmatpush1.bf16.msra.mxu1 %v2832_v24 }
 0x345   : > { %1563 = vmatprep.subr.bf16.mxu0 %v2834_v25  ;;  %1604 = vmatprep.subr.bf16.mxu1 %v2836_v26 }
 0x348   : > { %1564 = vmatpush1.bf16.msra.mxu0 %v2842_v27  ;;  %1605 = vmatpush1.bf16.msra.mxu1 %v2844_v28 }
 0x349   : > { %1565 = vmatprep.subr.bf16.mxu0 %v2846_v29  ;;  %1606 = vmatprep.subr.bf16.mxu1 %v2848_v30 }
 0x34c   : > { %1566 = vmatpush1.bf16.msra.mxu0 %v2854_v31  ;;  %1607 = vmatpush1.bf16.msra.mxu1 %v2856_v32 }
 0x34d   : > { %1567 = vmatprep.subr.bf16.mxu0 %v2858_v33  ;;  %1608 = vmatprep.subr.bf16.mxu1 %v2860_v34 }
 0x350   : > { %1568 = vmatpush1.bf16.msra.mxu0 %v2866_v37  ;;  %1609 = vmatpush1.bf16.msra.mxu1 %v2868_v38 }
 0x406   : > { %v1465_v6 = vpop.f32.mrb[16].mxu0  ;;  %v1506_v7 = vpop.f32.mrb[16].mxu1 }
 0x407   : > { %v1513_v9 = vadd.f32 %v1465_v6, %v3168_v8  ;;  %v1515_v11 = vadd.f32 %v1506_v7, %v3169_v10  ;;  %v1467_v12 = vpop.f32.mrb[17].mxu0  ;;  %v1508_v13 = vpop.f32.mrb[17].mxu1 }
 0x408   : > { %v1514_v16 = vadd.f32 %v1467_v12, %v3170_v15  ;;  %v1516_v18 = vadd.f32 %v1508_v13, %v3171_v17  ;;  %v1469_v19 = vpop.f32.mrb[18].mxu0  ;;  %v1510_v20 = vpop.f32.mrb[18].mxu1 }
 0x409   : > { %v1901_v21 = vmul.f32 -1.442695, %v1513_v9  ;;  %v1470_v22 = vpop.f32.mrb[19].mxu0  ;;  %v1511_v23 = vpop.f32.mrb[19].mxu1 }
 0x40a   : > { %v1902_v24 = vmul.f32 -1.442695, %v1514_v16  ;;  %v1903_v25 = vmul.f32 -1.442695, %v1516_v18 }
 0x40b   : > { %2112 = vpow2.f32 %v1901_v21 }
 0x40c   : > { %2114 = vpow2.f32 %v1902_v24 }
 0x40d   : > { %2116 = vpow2.f32 %v1903_v25 }
 0x40e   : > { %2118 = vtanh.f32 %v1515_v11 }
 0x415   : > { %v2113_v26 = vpop.eup %2112 }
 0x416   : > { %v2115_v27 = vpop.eup %2114  ;;  %v1520_v28 = vadd.f32 1.0, %v2113_v26 }
 0x417   : > { %v1526_v29 = vadd.f32 1.0, %v2115_v27  ;;  %v2117_v30 = vpop.eup %2116 }
 0x418   : > { %2120 = vrcp.f32 %v1520_v28  ;;  %v2119_v31 = vpop.eup %2118  ;;  %v1533_v37 = vadd.f32 1.0, %v2117_v30 }
 0x419   : > { %2122 = vrcp.f32 %v1526_v29 }
 0x41a   : > { %2124 = vrcp.f32 %v1533_v37 }
 0x422   : > { %v2121_v32 = vpop.eup %2120 }
 0x423   : > { %v2123_v33 = vpop.eup %2122  ;;  %v1538_v34 = vmul.f32 %v2121_v32, %v2119_v31 }
 0x424   : > { %v1537_v38 = vmul.f32 %v2123_v33, %v2975_v40  ;;  %v2125_v58 = vpop.eup %2124 }
 0x426   : > { %v1539_v44 = vadd.f32 %v1538_v34, %v1537_v38 }
 0x428   : > { %2126 = vtanh.f32 %v1539_v44 }
 0x432   : > { %v2127_v60 = vpop.eup %2126 }
 0x433   : > { %v1541_v63 = vmul.f32 %v2127_v60, %v2125_v58 }
 0x435   : > { %1904 = vst [vmem:[%s2708_s26 + $0x10] sm:$0xff] %v1541_v63  ;;  %v1547_v0 = vpack.c.bf16 %v1541_v63, %v1541_v63 }
 0x437   : > { %1586 = vmatmul.mubr.bf16.vlgmr.msra.gmra.mrb[20].mxu0 %v1547_v0  ;;  %1627 = vmatmul.mubr.bf16.vlgmr.msra.gmra.mrb[20].mxu1 %v1547_v0 }
 0x50a   : > { %v1587_v2 = vpop.f32.mrb[20].mxu0  ;;  %v1628_v14 = vpop.f32.mrb[20].mxu1 }
 0x50b   : > { %v1635_v41 = vadd.f32 %v1587_v2, %v3172_v39  ;;  %v1637_v47 = vadd.f32 %v1628_v14, %v3173_v43  ;;  %v1589_v48 = vpop.f32.mrb[21].mxu0  ;;  %v1630_v49 = vpop.f32.mrb[21].mxu1 }
 0x50c   : > { %v1636_v51 = vadd.f32 %v1589_v48, %v3174_v50  ;;  %v1638_v3 = vadd.f32 %v1630_v49, %v2930_v55  ;;  %v1591_v4 = vpop.f32.mrb[22].mxu0  ;;  %v1632_v52 = vpop.f32.mrb[22].mxu1 }
 0x50d   : > { %v1905_v53 = vmul.f32 -1.442695, %v1635_v41  ;;  %v1592_v57 = vpop.f32.mrb[23].mxu0  ;;  %v1633_v59 = vpop.f32.mrb[23].mxu1 }
 0x50e   : > { %v1906_v61 = vmul.f32 -1.442695, %v1636_v51  ;;  %v1907_v62 = vmul.f32 -1.442695, %v1638_v3 }
 0x50f   : > { %2128 = vpow2.f32 %v1905_v53 }
 0x510   : > { %2130 = vpow2.f32 %v1906_v61 }
 0x511   : > { %2132 = vpow2.f32 %v1907_v62 }
 0x512   : > { %2134 = vtanh.f32 %v1637_v47 }
 0x519   : > { %v2129_v54 = vpop.eup %2128 }
 0x51a   : > { %v2131_v5 = vpop.eup %2130  ;;  %v1642_v36 = vadd.f32 1.0, %v2129_v54 }
 0x51b   : > { %v1648_v1 = vadd.f32 1.0, %v2131_v5  ;;  %v2133_v55 = vpop.eup %2132 }
 0x51c   : > { %2136 = vrcp.f32 %v1642_v36  ;;  %v2135_v35 = vpop.eup %2134  ;;  %v1655_v46 = vadd.f32 1.0, %v2133_v55 }
 0x51d   : > { %2138 = vrcp.f32 %v1648_v1 }
 0x51e   : > { %2140 = vrcp.f32 %v1655_v46 }
 0x526   : > { %v2137_v40 = vpop.eup %2136 }
 0x527   : > { %v2139_v42 = vpop.eup %2138  ;;  %v1660_v45 = vmul.f32 %v2137_v40, %v2135_v35 }
 0x528   : > { %v1659_v56 = vmul.f32 %v2139_v42, %v1539_v44  ;;  %v2141_v7 = vpop.eup %2140 }
 0x52a   : > { %v1661_v6 = vadd.f32 %v1660_v45, %v1659_v56 }
 0x52c   : > { %2142 = vtanh.f32 %v1661_v6  ;;  %1664 = vst [vmem:[#allocation5] sm:$0xff] %v1661_v6  ;;  %1671 = vst [vmem:[#allocation18] sm:$0xff] %v1661_v6 }
 0x536   : > { %v2143_v8 = vpop.eup %2142 }
 0x537   : > { %v1663_v9 = vmul.f32 %v2143_v8, %v2141_v7 }
 0x539   : > { %1665 = vst [vmem:[#allocation4] sm:$0xff] %v1663_v9  ;;  %1908 = vst [vmem:[%s2708_s26 + $0x18] sm:$0xff] %v1663_v9 }
 0x53a   : > { %1669 = vst [vmem:[#allocation16] sm:$0xff] %v1663_v9 }
 0x53b   : > { %2299 = shalt.err (!%p2296_p12)
}
 0x53c   : > { %s3176_s30 = sld [smem:[#allocation34_spill]]  ;;  %p3178_p4 = pmov %p3175_p7 }
 0x542   : > { %s3177_s8 = smov %s3176_s30  ;;  %s2300_s24 = scalar_lea.hbm %s3176_s30, 128 }
 0x543   : > { %p2301_p2 = scmp.ne.s32.totalorder %s3177_s8, %s2300_s24  ;;  %p2306_p11 = scmp.lt.u32.totalorder %s2300_s24, %s3177_s8 }
 0x545   : > { %p2302_p8 = pnand %p2301_p2, %p3178_p4 }
 0x547   : > { %p2303_p9 = pneg %p2302_p8 }
 0x549   : > { %p2308_p3 = pnand %p2306_p11, %p2303_p9 }
 0x54b   : > { %2311 = shalt.err (!%p2308_p3)
}
 0x54c   : > { %p3179_p7 = pmov %p3178_p4  ;;  %s1673_s15 = scalar_lea.sflag [#allocation8], %s2690_s16 }
 0x54d   : > { %s2312_s14 = scalar_lea.vmem %s3028_s21, 512  ;;  %s2436_s30 = smov [#allocation15]  }
 0x54e   : > { %1940 = dma.vmem_to_hbm [thread:$0]  (%p3179_p7), %s1701_s25, 128, %s3177_s8, [#allocation17]  }
 0x54f   : > { %p2313_p10 = scmp.ne.s32.totalorder %s3028_s21, %s2312_s14  ;;  %s2316_s24 = sshll.u32 %s2436_s30, 4  ;;  %s2317_s24 = int_to_ptr.vmem [resolvable:$false] %s2316_s24 }
 0x550   : > { %s2318_s29 = scalar_lea.vmem %s2317_s24, 1024  ;;  %p2319_p5 = scmp.lt.s32.totalorder %s3028_s21, %s2317_s24 }
 0x551   : > { %p2314_p0 = pnand %p2313_p10, %p2632_p6  ;;  %p2320_p1 = scmp.lt.s32.totalorder %s2318_s29, %s2312_s14 }
 0x553   : > { %p2315_p13 = pneg %p2314_p0  ;;  %p2321_p12 = por %p2320_p1, %p2319_p5 }
 0x555   : > { %p2322_p2 = pnand %p2321_p12, %p2315_p13 }
 0x557   : > { %2325 = shalt.err (!%p2322_p2)
}
 0x558   : > { %s2326_s25 = scalar_lea.hbm %s3026_s27, 512  ;;  %s2330_s9 = scalar_lea.hbm %s3127_s7, 1024 }
 0x559   : > { %p2327_p4 = scmp.ne.s32.totalorder %s3026_s27, %s2326_s25  ;;  %p2331_p11 = scmp.lt.u32.totalorder %s3026_s27, %s3127_s7 }
 0x55a   : > { %p2332_p3 = scmp.lt.u32.totalorder %s2330_s9, %s2326_s25  ;;  %p2334_p10 = scmp.lt.u32.totalorder %s2326_s25, %s3026_s27 }
 0x55b   : > { %p2328_p8 = pnand %p2327_p4, %p2632_p6 }
 0x55c   : > { %p2333_p7 = por %p2332_p3, %p2331_p11 }
 0x55d   : > { %p2329_p9 = pneg %p2328_p8 }
 0x55e   : > { %p2335_p0 = por %p2334_p10, %p2333_p7 }
 0x560   : > { %p2336_p13 = pnand %p2335_p0, %p2329_p9 }
 0x562   : > { %2339 = shalt.err (!%p2336_p13)
}
 0x563   : > { %s2437_s14 = smov 128   ;;  %s2438_s30 = smov 8  }
 0x564   : > { %1938 = dma.vmem_to_hbm [thread:$0]  (%p2632_p6), %s3028_s21, 512, %s3026_s27, %s1673_s15, %s2437_s14, %s2437_s14, %s2438_s30  }
 0x565   : > { %s2340_s24 = scalar_lea.vmem %s3031_s18, 128  ;;  %p3180_p1 = scmp.eq.s32.totalorder %s2510_s13, 1 }
 0x566   : > { %p2341_p5 = scmp.ne.s32.totalorder %s3031_s18, %s2340_s24  ;;  %p2347_p4 = scmp.lt.s32.totalorder %s3031_s18, %s3031_s18 }
 0x567   : > { %p2348_p8 = scmp.lt.s32.totalorder %s2340_s24, %s2340_s24 }
 0x568   : > { %p2342_p12 = pnand %p2341_p5, %p3180_p1 }
 0x569   : > { %p2349_p9 = por %p2348_p8, %p2347_p4 }
 0x56a   : > { %p2343_p2 = pneg %p2342_p12 }
 0x56c   : > { %p2350_p11 = pnand %p2349_p9, %p2343_p2 }
 0x56e   : > { %2353 = shalt.err (!%p2350_p11)
}
 0x56f   : > { %s3181_s26 = sld [smem:[#allocation35_spill]]  ;;  %p3182_p3 = pmov %p3180_p1 }
 0x575   : > { %s2354_s20 = scalar_lea.hbm %s3181_s26, 128 }
 0x576   : > { %p2355_p6 = scmp.ne.s32.totalorder %s3181_s26, %s2354_s20  ;;  %p2360_p0 = scmp.lt.u32.totalorder %s2354_s20, %s3181_s26 }
 0x578   : > { %p2356_p7 = pnand %p2355_p6, %p3182_p3 }
 0x57a   : > { %p2357_p10 = pneg %p2356_p7 }
 0x57c   : > { %p2362_p13 = pnand %p2360_p0, %p2357_p10 }
 0x57e   : > { %2365 = shalt.err (!%p2362_p13)
}
 0x57f   : > { %p3183_p5 = pmov %p3180_p1 }
 0x581   : > { %1942 = dma.vmem_to_hbm [thread:$0]  (%p3183_p5), %s3031_s18, 128, %s3181_s26, [#allocation17]  }
 0x582   : > { %2399 = dma.done.wait (%p3180_p1), [#allocation17], 256   ;;  %p3184_p12 = pmov %p3180_p1 }
 0x584   : > { %2401 = vsyncadd (%p3184_p12), [#allocation17], 4294967040 }
 0x585 PF: > { %s3185_s23 = sld [smem:[#allocation25_spill]]  ;;  %s3186_s17 = sld [smem:[#allocation26_spill]] }
 0x586   : > { %p3188_p4 = scmp.ge.s32.totalorder %s2420_s12, 2 }
 0x58b   : > { %s1731_s14 = sand.u32 1, %s3185_s23   ;;  %p3187_p2 = scmp.ne.s32.totalorder %s3186_s17, 0 }
 0x58c   : > { %s1732_s30 = scalar_lea.sflag [#allocation8], %s1731_s14 }
 0x58d   : > { %p1966_p8 = pnand %p3188_p4, %p3187_p2 }
 0x58f   : > { %2403 = dma.done.wait (!%p1966_p8), %s1732_s30, 512  }
 0x590   : > { %2405 = vsyncadd (!%p1966_p8), %s1732_s30, 4294966784  ;;  %p26_p9 = scmp.ge.s32.totalorder %s2622_s28, 4   ;;  %s3189_s30 = smov %s2412_s10 }
 0x591   : > { %s3190_s10 = smov %s2416_s11  ;;  %s3191_s11 = smov %s2638_s19 }
 0x592   : > { %s3192_s12 = smov %s2622_s28  ;;  %28 = sbr.rel (!%p26_p9) target bundleno = 11 (0xb), region = 136 }
 0x599   :  { %1737 = vsyncpa [#allocation7], 1 }
 0x59a   :  { %1739 = vsyncpa [#allocation7 + $0x1], 1 }
 0x59b   :  { %1740 = vsyncpa [#allocation10], 1 }
 0x59c   :  { %1742 = vsyncpa [#allocation10 + $0x1], 1 }
 0x59d   :  { %1743 = vsyncpa [#allocation13], 1 }
 0x59e   :  { %1744 = vsyncpa [#allocation8], 1 }
 0x59f   :  { %1746 = vsyncpa [#allocation8 + $0x1], 1 }
 0x5a0   :  { %1747 = vsyncpa [#allocation17], 1 }

</bundles_post_ra>
